<compile_context>
chip_gen: v7x
topology: tpu7x:2x2x1
jax: 0.10.0
libtpu: 0.0.40
codegen_flags: <defaults>
</compile_context>

<pallas_src>
import jax
import jax.numpy as jnp
from jax import lax
from jax.experimental import pallas as pl
from jax.experimental.pallas import tpu as pltpu


# ----------------------------------------------------------------------------
# Fused Pallas kernel: 2 BiLSTM layers + tanh + Linear head
# ----------------------------------------------------------------------------
def _textrnn_kernel(xp_ref,                                   # [T, B, 2H]  [x_t | x_{T-1-t}]
                    wih0_ref, whh0_ref, b0_ref,               # [2H,8H], [2H,8H], [1,8H]
                    w1ft_ref, w1fb_ref, whh1f_ref, b1f_ref,   # [2H,4H], [2H,4H], [H,4H], [1,4H]
                    w1bt_ref, w1bb_ref, b1b_ref,              # [2H,4H], [2H,4H], [1,4H]
                    fcw_ref, fcb_ref,                         # [2H,C], [1,C]
                    logits_ref, hid_ref,                      # [B,C], [B,2H]
                    z0_ref, z1t_ref, z1b_ref, hseq_ref):      # VMEM scratch
    T, B, _ = xp_ref.shape
    H = whh1f_ref.shape[0]

    # ---------------- layer 0: fused fwd+bwd recurrence ----------------
    # Hoisted input projection for BOTH directions in one matmul.  Because the
    # wrapper paired the inputs as [x_t | x_{T-1-t}], row t of z0 is already
    # time-aligned for both directions (fwd gates from x_t, bwd from x_{T-1-t}).
    # Gate-major column layout: [i_f,i_b | f_f,f_b | o_f,o_b | g_f,g_b].
    xp = xp_ref[...]
    z0_ref[...] = (jnp.dot(xp.reshape(T * B, 2 * H), wih0_ref[...],
                           preferred_element_type=jnp.float32)
                   + b0_ref[...]).reshape(T, B, 8 * H)

    whh0 = whh0_ref[...]                                      # block-diagonal [2H, 8H]

    def step0(t, carry):
        h, c = carry                                          # [B, 2H] = [h_f | h_b]
        z = z0_ref[t] + jnp.dot(h, whh0, preferred_element_type=jnp.float32)
        s = jax.nn.sigmoid(z[:, 0:6 * H])                     # i,f,o (both directions)
        g = jnp.tanh(z[:, 6 * H:8 * H])                       # g     (both directions)
        c = s[:, 2 * H:4 * H] * c + s[:, 0:2 * H] * g
        h = s[:, 4 * H:6 * H] * jnp.tanh(c)
        hseq_ref[t] = h     # lanes [0:H] = h_f(t), lanes [H:2H] = h_b(T-1-t)
        return h, c

    zz2 = jnp.zeros((B, 2 * H), jnp.float32)
    lax.fori_loop(0, T, step0, (zz2, zz2), unroll=True)

    # ---------------- layer 1: forward recurrence ----------------
    # Hoisted input projections straight from the paired layer-0 rows.  The
    # fwd-half (h_f(t)) contribution is time-aligned at row t; the bwd-half
    # (h_b(T-1-t)) contribution is read mirrored (row T-1-t) inside the loop.
    hseq2 = hseq_ref[...].reshape(T * B, 2 * H)
    z1t_ref[...] = (jnp.dot(hseq2, w1ft_ref[...], preferred_element_type=jnp.float32)
                    + b1f_ref[...]).reshape(T, B, 4 * H)
    z1b_ref[...] = jnp.dot(hseq2, w1fb_ref[...],
                           preferred_element_type=jnp.float32).reshape(T, B, 4 * H)

    whh1f = whh1f_ref[...]                                    # [H, 4H], cols (i,f,o,g)

    def step1(t, carry):
        h, c = carry                                          # [B, H]
        z = (z1t_ref[t] + z1b_ref[T - 1 - t]
             + jnp.dot(h, whh1f, preferred_element_type=jnp.float32))
        s = jax.nn.sigmoid(z[:, 0:3 * H])
        g = jnp.tanh(z[:, 3 * H:4 * H])
        c = s[:, H:2 * H] * c + s[:, 0:H] * g
        h = s[:, 2 * H:3 * H] * jnp.tanh(c)
        return h, c

    zz1 = jnp.zeros((B, H), jnp.float32)
    hf, _ = lax.fori_loop(0, T, step1, (zz1, zz1), unroll=True)

    # ---------------- layer 1: reverse direction ----------------
    # The head consumes only output[:, -1, :]; for the reverse direction that is
    # the hidden after its FIRST step (processing seq[T-1]) from zero state, so
    # the h @ W_hh term is exactly zero and is dropped.
    # seq[T-1] = [h0_f(T-1) | h0_b(T-1)] = [hseq[T-1, :, :H] | hseq[0, :, H:]].
    zb = (jnp.dot(hseq_ref[T - 1], w1bt_ref[...], preferred_element_type=jnp.float32)
          + jnp.dot(hseq_ref[0], w1bb_ref[...], preferred_element_type=jnp.float32)
          + b1b_ref[...])                                     # [B, 4H] (i,f,o,g)
    sb = jax.nn.sigmoid(zb[:, 0:3 * H])
    gb = jnp.tanh(zb[:, 3 * H:4 * H])
    cb = sb[:, 0:H] * gb                                      # f * 0 + i * g
    hb = sb[:, 2 * H:3 * H] * jnp.tanh(cb)

    # ---------------- head ----------------
    hstate = jnp.concatenate([jnp.tanh(hf), jnp.tanh(hb)], axis=-1)   # [B, 2H]
    hid_ref[...] = hstate
    logits_ref[...] = (jnp.dot(hstate, fcw_ref[...], preferred_element_type=jnp.float32)
                       + fcb_ref[...])


# ----------------------------------------------------------------------------
# Parameter packing: PyTorch-layout params -> kernel layout
# ----------------------------------------------------------------------------
def _gate_reorder_ifog(w):
    """Reorder PyTorch gate blocks (i, f, g, o) -> (i, f, o, g) along axis 0."""
    H = w.shape[0] // 4
    return jnp.concatenate([w[0:2 * H], w[3 * H:4 * H], w[2 * H:3 * H]], axis=0)


def _interleave_dirs(a, b, H):
    """a, b: [..., 4H] (gate groups i,f,o,g) -> [..., 8H] interleaved per gate:
    [i_f, i_b, f_f, f_b, o_f, o_b, g_f, g_b]."""
    parts = []
    for k in range(4):
        parts += [a[..., k * H:(k + 1) * H], b[..., k * H:(k + 1) * H]]
    return jnp.concatenate(parts, axis=-1)


def pack_params(raw, H):
    def kgates(w):                 # PyTorch [4H, D] -> kernel [D, 4H] cols (i,f,o,g)
        return _gate_reorder_ifog(w).T

    def kbias(d):                  # combined bias, kernel gate order, shape [1, 4H]
        return _gate_reorder_ifog(d["b_ih"] + d["b_hh"])[None, :]

    z4 = jnp.zeros((H, 4 * H), jnp.float32)
    l0f, l0b = raw["lstm"][0]["f"], raw["lstm"][0]["b"]
    l1f, l1b = raw["lstm"][1]["f"], raw["lstm"][1]["b"]

    # Layer 0: block layout over the paired input [x_t | x_{T-1-t}] and the
    # combined state [h_f | h_b]; gate-major interleaved 8H columns.
    wih0p = jnp.concatenate([_interleave_dirs(kgates(l0f["w_ih"]), z4, H),
                             _interleave_dirs(z4, kgates(l0b["w_ih"]), H)], axis=0)
    whh0p = jnp.concatenate([_interleave_dirs(kgates(l0f["w_hh"]), z4, H),
                             _interleave_dirs(z4, kgates(l0b["w_hh"]), H)], axis=0)
    b0p = _interleave_dirs(kbias(l0f), kbias(l0b), H)

    # Layer 1: split each [2H, 4H] input-weight into zero-padded top/bot halves
    # so the kernel can feed them from the paired layer-0 rows without any
    # lane un-interleaving.
    wih1f = kgates(l1f["w_ih"])
    wih1b = kgates(l1b["w_ih"])
    w1f_top = jnp.concatenate([wih1f[0:H], z4], axis=0)
    w1f_bot = jnp.concatenate([z4, wih1f[H:2 * H]], axis=0)
    w1b_top = jnp.concatenate([wih1b[0:H], z4], axis=0)
    w1b_bot = jnp.concatenate([z4, wih1b[H:2 * H]], axis=0)

    return dict(wih0p=wih0p, whh0p=whh0p, b0p=b0p,
                w1f_top=w1f_top, w1f_bot=w1f_bot,
                whh1f=kgates(l1f["w_hh"]), b1f=kbias(l1f),
                w1b_top=w1b_top, w1b_bot=w1b_bot, b1b=kbias(l1b),
                fcw=raw["fc_w"].T, fcb=raw["fc_b"][None, :])


# ----------------------------------------------------------------------------
# Wrapper (single pallas_call)
# ----------------------------------------------------------------------------
def text_rnn_forward(x, raw_params):
    """Matches TextRNN.forward (eval mode): returns (logits, hidden_state)."""
    x = x.astype(jnp.float32)           # x.float(); dropout (eval) = identity
    B, T, _ = x.shape
    H = raw_params["lstm"][0]["f"]["w_hh"].shape[1]
    C = raw_params["fc_w"].shape[0]
    p = pack_params(raw_params, H)

    # Wrapper-side layout plumbing (pure XLA, off the kernel's critical path):
    # time-major + fwd/bwd time pairing so the fused layer-0 z is pre-aligned.
    x_tb = jnp.transpose(x, (1, 0, 2))                       # [T, B, H]
    x_pair = jnp.concatenate([x_tb, x_tb[::-1]], axis=-1)    # [T, B, 2H]

    logits, hidden_state = pl.pallas_call(
        _textrnn_kernel,
        out_shape=(jax.ShapeDtypeStruct((B, C), jnp.float32),
                   jax.ShapeDtypeStruct((B, 2 * H), jnp.float32)),
        scratch_shapes=[
            pltpu.VMEM((T, B, 8 * H), jnp.float32),   # z0   : layer-0 input proj (paired)
            pltpu.VMEM((T, B, 4 * H), jnp.float32),   # z1t  : layer-1 fwd-half contribution
            pltpu.VMEM((T, B, 4 * H), jnp.float32),   # z1b  : layer-1 bwd-half contribution
            pltpu.VMEM((T, B, 2 * H), jnp.float32),   # hseq : layer-0 outputs (paired rows)
        ],
    )(x_pair,
      p["wih0p"], p["whh0p"], p["b0p"],
      p["w1f_top"], p["w1f_bot"], p["whh1f"], p["b1f"],
      p["w1b_top"], p["w1b_bot"], p["b1b"],
      p["fcw"], p["fcb"])
    return logits, hidden_state


# ----------------------------------------------------------------------------
# Deterministic PyTorch-style parameter init (uniform(-1/sqrt(H), 1/sqrt(H)))
# ----------------------------------------------------------------------------
def init_params(key, hidden_size, num_classes, num_layers=2):
    H = hidden_size
    k = 1.0 / (H ** 0.5)
    lstm = []
    for layer in range(num_layers):
        d_in = H if layer == 0 else 2 * H
        dirs = {}
        for d in ("f", "b"):
            key, k1, k2, k3, k4 = jax.random.split(key, 5)
            dirs[d] = dict(
                w_ih=jax.random.uniform(k1, (4 * H, d_in), jnp.float32, -k, k),
                w_hh=jax.random.uniform(k2, (4 * H, H), jnp.float32, -k, k),
                b_ih=jax.random.uniform(k3, (4 * H,), jnp.float32, -k, k),
                b_hh=jax.random.uniform(k4, (4 * H,), jnp.float32, -k, k))
        lstm.append(dirs)
    key, kw, kb = jax.random.split(key, 3)
    kfc = 1.0 / ((2 * H) ** 0.5)
    return dict(
        lstm=lstm,
        fc_w=jax.random.uniform(kw, (num_classes, 2 * H), jnp.float32, -kfc, kfc),
        fc_b=jax.random.uniform(kb, (num_classes,), jnp.float32, -kfc, kfc))


# ----------------------------------------------------------------------------
# Pure-JAX reference (PyTorch semantics, for correctness check)
# ----------------------------------------------------------------------------
def _ref_lstm_dir(x, p, reverse):
    B, T, _ = x.shape
    H = p["w_hh"].shape[1]
    wih, whh = p["w_ih"].T, p["w_hh"].T
    b = (p["b_ih"] + p["b_hh"])[None, :]
    xs = x[:, ::-1, :] if reverse else x

    def step(carry, xt):
        h, c = carry
        z = xt @ wih + h @ whh + b
        i = jax.nn.sigmoid(z[:, 0:H])
        f = jax.nn.sigmoid(z[:, H:2 * H])
        g = jnp.tanh(z[:, 2 * H:3 * H])
        o = jax.nn.sigmoid(z[:, 3 * H:4 * H])
        c = f * c + i * g
        h = o * jnp.tanh(c)
        return (h, c), h

    init = (jnp.zeros((B, H), jnp.float32), jnp.zeros((B, H), jnp.float32))
    _, hs = lax.scan(step, init, jnp.transpose(xs, (1, 0, 2)))
    hs = jnp.transpose(hs, (1, 0, 2))
    return hs[:, ::-1, :] if reverse else hs


def text_rnn_forward_ref(x, raw):
    inp = x.astype(jnp.float32)
    for layer in raw["lstm"]:
        hf = _ref_lstm_dir(inp, layer["f"], reverse=False)
        hb = _ref_lstm_dir(inp, layer["b"], reverse=True)
        inp = jnp.concatenate([hf, hb], axis=-1)
    h = jnp.tanh(inp[:, -1, :])
    return h @ raw["fc_w"].T + raw["fc_b"][None, :], h


# ----------------------------------------------------------------------------
if __name__ == "__main__":
    B, T, H, C = 2, 8, 32, 5   # batch, seq, hidden_size, num_labels

    key = jax.random.PRNGKey(0)
    key, kx, kp = jax.random.split(key, 3)
    x = jax.random.normal(kx, (B, T, H), jnp.float32)
    raw_params = init_params(kp, H, C)

    logits, hidden_state = jax.jit(text_rnn_forward)(x, raw_params)
    jax.block_until_ready((logits, hidden_state))

    ref_logits, ref_hidden = text_rnn_forward_ref(x, raw_params)
    assert logits.shape == (B, C) and hidden_state.shape == (B, 2 * H)
    assert jnp.allclose(logits, ref_logits, atol=1e-4, rtol=1e-4), \
        float(jnp.max(jnp.abs(logits - ref_logits)))
    assert jnp.allclose(hidden_state, ref_hidden, atol=1e-4, rtol=1e-4), \
        float(jnp.max(jnp.abs(hidden_state - ref_hidden)))

    print("KERNEL_OK")
</pallas_src>

<mosaic_0001>
module attributes {stable_mosaic.version = 11 : i64} {
  func.func @_textrnn_kernel(%arg0: memref<8x2x64xf32, #tpu.memory_space<vmem>>, %arg1: memref<64x256xf32, #tpu.memory_space<vmem>>, %arg2: memref<64x256xf32, #tpu.memory_space<vmem>>, %arg3: memref<1x256xf32, #tpu.memory_space<vmem>>, %arg4: memref<64x128xf32, #tpu.memory_space<vmem>>, %arg5: memref<64x128xf32, #tpu.memory_space<vmem>>, %arg6: memref<32x128xf32, #tpu.memory_space<vmem>>, %arg7: memref<1x128xf32, #tpu.memory_space<vmem>>, %arg8: memref<64x128xf32, #tpu.memory_space<vmem>>, %arg9: memref<64x128xf32, #tpu.memory_space<vmem>>, %arg10: memref<1x128xf32, #tpu.memory_space<vmem>>, %arg11: memref<64x5xf32, #tpu.memory_space<vmem>>, %arg12: memref<1x5xf32, #tpu.memory_space<vmem>>, %arg13: memref<2x5xf32, #tpu.memory_space<vmem>>, %arg14: memref<2x64xf32, #tpu.memory_space<vmem>>, %arg15: memref<8x2x256xf32, #tpu.memory_space<vmem>>, %arg16: memref<8x2x128xf32, #tpu.memory_space<vmem>>, %arg17: memref<8x2x128xf32, #tpu.memory_space<vmem>>, %arg18: memref<8x2x64xf32, #tpu.memory_space<vmem>>) attributes {dimension_semantics = [], scalar_prefetch = 0 : i64, scratch_operands = 4 : i64, tpu.core_type = #tpu.core_type<tc>} {
    %c0 = arith.constant 0 : index
    %c0_0 = arith.constant 0 : index
    %c0_1 = arith.constant 0 : index
    %0 = vector.load %arg0[%c0, %c0_0, %c0_1] : memref<8x2x64xf32, #tpu.memory_space<vmem>>, vector<8x2x64xf32>
    %1 = vector.shape_cast %0 : vector<8x2x64xf32> to vector<16x64xf32>
    %c0_2 = arith.constant 0 : index
    %c0_3 = arith.constant 0 : index
    %2 = vector.load %arg1[%c0_2, %c0_3] : memref<64x256xf32, #tpu.memory_space<vmem>>, vector<64x256xf32>
    %cst = arith.constant dense<0.000000e+00> : vector<16x256xf32>
    %3 = tpu.matmul %1, %2, %cst {dimension_numbers = #tpu.dot_dimension_numbers<[1], [0], [0], [1], [0, 0, 1, 1], [], []>} : vector<16x64xf32>, vector<64x256xf32>, vector<16x256xf32> -> vector<16x256xf32>
    %c0_4 = arith.constant 0 : index
    %c0_5 = arith.constant 0 : index
    %4 = vector.load %arg3[%c0_4, %c0_5] : memref<1x256xf32, #tpu.memory_space<vmem>>, vector<1x256xf32>
    %5 = vector.broadcast %4 : vector<1x256xf32> to vector<16x256xf32>
    %6 = arith.addf %3, %5 : vector<16x256xf32>
    %7 = vector.shape_cast %6 : vector<16x256xf32> to vector<8x2x256xf32>
    %c0_6 = arith.constant 0 : index
    %c0_7 = arith.constant 0 : index
    %c0_8 = arith.constant 0 : index
    %8 = vector.load %arg15[%c0_6, %c0_7, %c0_8] : memref<8x2x256xf32, #tpu.memory_space<vmem>>, vector<8x2x256xf32>
    tpu.vector_store %arg15[%c0_6, %c0_7, %c0_8], %7 {strides = array<i32>} : memref<8x2x256xf32, #tpu.memory_space<vmem>>, vector<8x2x256xf32>,
    %c0_9 = arith.constant 0 : index
    %c0_10 = arith.constant 0 : index
    %9 = vector.load %arg2[%c0_9, %c0_10] : memref<64x256xf32, #tpu.memory_space<vmem>>, vector<64x256xf32>
    %cst_11 = arith.constant 0.000000e+00 : f32
    %10 = vector.broadcast %cst_11 : f32 to vector<2x64xf32>
    %c0_i32 = arith.constant 0 : i32
    %11 = arith.index_cast %c0_i32 : i32 to index
    %c0_12 = arith.constant 0 : index
    %c0_13 = arith.constant 0 : index
    %12 = vector.load %arg15[%11, %c0_12, %c0_13] : memref<8x2x256xf32, #tpu.memory_space<vmem>>, vector<1x2x256xf32>
    %13 = vector.shape_cast %12 : vector<1x2x256xf32> to vector<2x256xf32>
    %cst_14 = arith.constant dense<0.000000e+00> : vector<2x256xf32>
    %14 = tpu.matmul %10, %9, %cst_14 {dimension_numbers = #tpu.dot_dimension_numbers<[1], [0], [0], [1], [0, 0, 1, 1], [], []>} : vector<2x64xf32>, vector<64x256xf32>, vector<2x256xf32> -> vector<2x256xf32>
    %15 = arith.addf %13, %14 : vector<2x256xf32>
    %16 = vector.extract_strided_slice %15 {offsets = [0, 0], sizes = [2, 192], strides = [1, 1]} : vector<2x256xf32> to vector<2x192xf32>
    %17 = arith.negf %16 : vector<2x192xf32>
    %18 = math.exp %17 : vector<2x192xf32>
    %cst_15 = arith.constant 1.000000e+00 : f32
    %19 = vector.broadcast %cst_15 : f32 to vector<2x192xf32>
    %20 = arith.addf %19, %18 : vector<2x192xf32>
    %21 = arith.divf %19, %20 : vector<2x192xf32>
    %22 = vector.extract_strided_slice %15 {offsets = [0, 192], sizes = [2, 64], strides = [1, 1]} : vector<2x256xf32> to vector<2x64xf32>
    %23 = math.tanh %22 : vector<2x64xf32>
    %24 = vector.extract_strided_slice %21 {offsets = [0, 64], sizes = [2, 64], strides = [1, 1]} : vector<2x192xf32> to vector<2x64xf32>
    %25 = arith.mulf %24, %10 : vector<2x64xf32>
    %26 = vector.extract_strided_slice %21 {offsets = [0, 0], sizes = [2, 64], strides = [1, 1]} : vector<2x192xf32> to vector<2x64xf32>
    %27 = arith.mulf %26, %23 : vector<2x64xf32>
    %28 = arith.addf %25, %27 : vector<2x64xf32>
    %29 = vector.extract_strided_slice %21 {offsets = [0, 128], sizes = [2, 64], strides = [1, 1]} : vector<2x192xf32> to vector<2x64xf32>
    %30 = math.tanh %28 : vector<2x64xf32>
    %31 = arith.mulf %29, %30 : vector<2x64xf32>
    %32 = arith.index_cast %c0_i32 : i32 to index
    %c0_16 = arith.constant 0 : index
    %c0_17 = arith.constant 0 : index
    %33 = vector.load %arg18[%32, %c0_16, %c0_17] : memref<8x2x64xf32, #tpu.memory_space<vmem>>, vector<1x2x64xf32>
    %34 = vector.shape_cast %33 : vector<1x2x64xf32> to vector<2x64xf32>
    %35 = vector.shape_cast %31 : vector<2x64xf32> to vector<1x2x64xf32>
    tpu.vector_store %arg18[%32, %c0_16, %c0_17], %35 {strides = array<i32>} : memref<8x2x64xf32, #tpu.memory_space<vmem>>, vector<1x2x64xf32>,
    %c1_i32 = arith.constant 1 : i32
    %36 = arith.index_cast %c1_i32 : i32 to index
    %c0_18 = arith.constant 0 : index
    %c0_19 = arith.constant 0 : index
    %37 = vector.load %arg15[%36, %c0_18, %c0_19] : memref<8x2x256xf32, #tpu.memory_space<vmem>>, vector<1x2x256xf32>
    %38 = vector.shape_cast %37 : vector<1x2x256xf32> to vector<2x256xf32>
    %cst_20 = arith.constant dense<0.000000e+00> : vector<2x256xf32>
    %39 = tpu.matmul %31, %9, %cst_20 {dimension_numbers = #tpu.dot_dimension_numbers<[1], [0], [0], [1], [0, 0, 1, 1], [], []>} : vector<2x64xf32>, vector<64x256xf32>, vector<2x256xf32> -> vector<2x256xf32>
    %40 = arith.addf %38, %39 : vector<2x256xf32>
    %41 = vector.extract_strided_slice %40 {offsets = [0, 0], sizes = [2, 192], strides = [1, 1]} : vector<2x256xf32> to vector<2x192xf32>
    %42 = arith.negf %41 : vector<2x192xf32>
    %43 = math.exp %42 : vector<2x192xf32>
    %cst_21 = arith.constant 1.000000e+00 : f32
    %44 = vector.broadcast %cst_21 : f32 to vector<2x192xf32>
    %45 = arith.addf %44, %43 : vector<2x192xf32>
    %46 = arith.divf %44, %45 : vector<2x192xf32>
    %47 = vector.extract_strided_slice %40 {offsets = [0, 192], sizes = [2, 64], strides = [1, 1]} : vector<2x256xf32> to vector<2x64xf32>
    %48 = math.tanh %47 : vector<2x64xf32>
    %49 = vector.extract_strided_slice %46 {offsets = [0, 64], sizes = [2, 64], strides = [1, 1]} : vector<2x192xf32> to vector<2x64xf32>
    %50 = arith.mulf %49, %28 : vector<2x64xf32>
    %51 = vector.extract_strided_slice %46 {offsets = [0, 0], sizes = [2, 64], strides = [1, 1]} : vector<2x192xf32> to vector<2x64xf32>
    %52 = arith.mulf %51, %48 : vector<2x64xf32>
    %53 = arith.addf %50, %52 : vector<2x64xf32>
    %54 = vector.extract_strided_slice %46 {offsets = [0, 128], sizes = [2, 64], strides = [1, 1]} : vector<2x192xf32> to vector<2x64xf32>
    %55 = math.tanh %53 : vector<2x64xf32>
    %56 = arith.mulf %54, %55 : vector<2x64xf32>
    %57 = arith.index_cast %c1_i32 : i32 to index
    %c0_22 = arith.constant 0 : index
    %c0_23 = arith.constant 0 : index
    %58 = vector.load %arg18[%57, %c0_22, %c0_23] : memref<8x2x64xf32, #tpu.memory_space<vmem>>, vector<1x2x64xf32>
    %59 = vector.shape_cast %58 : vector<1x2x64xf32> to vector<2x64xf32>
    %60 = vector.shape_cast %56 : vector<2x64xf32> to vector<1x2x64xf32>
    tpu.vector_store %arg18[%57, %c0_22, %c0_23], %60 {strides = array<i32>} : memref<8x2x64xf32, #tpu.memory_space<vmem>>, vector<1x2x64xf32>,
    %c2_i32 = arith.constant 2 : i32
    %61 = arith.index_cast %c2_i32 : i32 to index
    %c0_24 = arith.constant 0 : index
    %c0_25 = arith.constant 0 : index
    %62 = vector.load %arg15[%61, %c0_24, %c0_25] : memref<8x2x256xf32, #tpu.memory_space<vmem>>, vector<1x2x256xf32>
    %63 = vector.shape_cast %62 : vector<1x2x256xf32> to vector<2x256xf32>
    %cst_26 = arith.constant dense<0.000000e+00> : vector<2x256xf32>
    %64 = tpu.matmul %56, %9, %cst_26 {dimension_numbers = #tpu.dot_dimension_numbers<[1], [0], [0], [1], [0, 0, 1, 1], [], []>} : vector<2x64xf32>, vector<64x256xf32>, vector<2x256xf32> -> vector<2x256xf32>
    %65 = arith.addf %63, %64 : vector<2x256xf32>
    %66 = vector.extract_strided_slice %65 {offsets = [0, 0], sizes = [2, 192], strides = [1, 1]} : vector<2x256xf32> to vector<2x192xf32>
    %67 = arith.negf %66 : vector<2x192xf32>
    %68 = math.exp %67 : vector<2x192xf32>
    %cst_27 = arith.constant 1.000000e+00 : f32
    %69 = vector.broadcast %cst_27 : f32 to vector<2x192xf32>
    %70 = arith.addf %69, %68 : vector<2x192xf32>
    %71 = arith.divf %69, %70 : vector<2x192xf32>
    %72 = vector.extract_strided_slice %65 {offsets = [0, 192], sizes = [2, 64], strides = [1, 1]} : vector<2x256xf32> to vector<2x64xf32>
    %73 = math.tanh %72 : vector<2x64xf32>
    %74 = vector.extract_strided_slice %71 {offsets = [0, 64], sizes = [2, 64], strides = [1, 1]} : vector<2x192xf32> to vector<2x64xf32>
    %75 = arith.mulf %74, %53 : vector<2x64xf32>
    %76 = vector.extract_strided_slice %71 {offsets = [0, 0], sizes = [2, 64], strides = [1, 1]} : vector<2x192xf32> to vector<2x64xf32>
    %77 = arith.mulf %76, %73 : vector<2x64xf32>
    %78 = arith.addf %75, %77 : vector<2x64xf32>
    %79 = vector.extract_strided_slice %71 {offsets = [0, 128], sizes = [2, 64], strides = [1, 1]} : vector<2x192xf32> to vector<2x64xf32>
    %80 = math.tanh %78 : vector<2x64xf32>
    %81 = arith.mulf %79, %80 : vector<2x64xf32>
    %82 = arith.index_cast %c2_i32 : i32 to index
    %c0_28 = arith.constant 0 : index
    %c0_29 = arith.constant 0 : index
    %83 = vector.load %arg18[%82, %c0_28, %c0_29] : memref<8x2x64xf32, #tpu.memory_space<vmem>>, vector<1x2x64xf32>
    %84 = vector.shape_cast %83 : vector<1x2x64xf32> to vector<2x64xf32>
    %85 = vector.shape_cast %81 : vector<2x64xf32> to vector<1x2x64xf32>
    tpu.vector_store %arg18[%82, %c0_28, %c0_29], %85 {strides = array<i32>} : memref<8x2x64xf32, #tpu.memory_space<vmem>>, vector<1x2x64xf32>,
    %c3_i32 = arith.constant 3 : i32
    %86 = arith.index_cast %c3_i32 : i32 to index
    %c0_30 = arith.constant 0 : index
    %c0_31 = arith.constant 0 : index
    %87 = vector.load %arg15[%86, %c0_30, %c0_31] : memref<8x2x256xf32, #tpu.memory_space<vmem>>, vector<1x2x256xf32>
    %88 = vector.shape_cast %87 : vector<1x2x256xf32> to vector<2x256xf32>
    %cst_32 = arith.constant dense<0.000000e+00> : vector<2x256xf32>
    %89 = tpu.matmul %81, %9, %cst_32 {dimension_numbers = #tpu.dot_dimension_numbers<[1], [0], [0], [1], [0, 0, 1, 1], [], []>} : vector<2x64xf32>, vector<64x256xf32>, vector<2x256xf32> -> vector<2x256xf32>
    %90 = arith.addf %88, %89 : vector<2x256xf32>
    %91 = vector.extract_strided_slice %90 {offsets = [0, 0], sizes = [2, 192], strides = [1, 1]} : vector<2x256xf32> to vector<2x192xf32>
    %92 = arith.negf %91 : vector<2x192xf32>
    %93 = math.exp %92 : vector<2x192xf32>
    %cst_33 = arith.constant 1.000000e+00 : f32
    %94 = vector.broadcast %cst_33 : f32 to vector<2x192xf32>
    %95 = arith.addf %94, %93 : vector<2x192xf32>
    %96 = arith.divf %94, %95 : vector<2x192xf32>
    %97 = vector.extract_strided_slice %90 {offsets = [0, 192], sizes = [2, 64], strides = [1, 1]} : vector<2x256xf32> to vector<2x64xf32>
    %98 = math.tanh %97 : vector<2x64xf32>
    %99 = vector.extract_strided_slice %96 {offsets = [0, 64], sizes = [2, 64], strides = [1, 1]} : vector<2x192xf32> to vector<2x64xf32>
    %100 = arith.mulf %99, %78 : vector<2x64xf32>
    %101 = vector.extract_strided_slice %96 {offsets = [0, 0], sizes = [2, 64], strides = [1, 1]} : vector<2x192xf32> to vector<2x64xf32>
    %102 = arith.mulf %101, %98 : vector<2x64xf32>
    %103 = arith.addf %100, %102 : vector<2x64xf32>
    %104 = vector.extract_strided_slice %96 {offsets = [0, 128], sizes = [2, 64], strides = [1, 1]} : vector<2x192xf32> to vector<2x64xf32>
    %105 = math.tanh %103 : vector<2x64xf32>
    %106 = arith.mulf %104, %105 : vector<2x64xf32>
    %107 = arith.index_cast %c3_i32 : i32 to index
    %c0_34 = arith.constant 0 : index
    %c0_35 = arith.constant 0 : index
    %108 = vector.load %arg18[%107, %c0_34, %c0_35] : memref<8x2x64xf32, #tpu.memory_space<vmem>>, vector<1x2x64xf32>
    %109 = vector.shape_cast %108 : vector<1x2x64xf32> to vector<2x64xf32>
    %110 = vector.shape_cast %106 : vector<2x64xf32> to vector<1x2x64xf32>
    tpu.vector_store %arg18[%107, %c0_34, %c0_35], %110 {strides = array<i32>} : memref<8x2x64xf32, #tpu.memory_space<vmem>>, vector<1x2x64xf32>,
    %c4_i32 = arith.constant 4 : i32
    %111 = arith.index_cast %c4_i32 : i32 to index
    %c0_36 = arith.constant 0 : index
    %c0_37 = arith.constant 0 : index
    %112 = vector.load %arg15[%111, %c0_36, %c0_37] : memref<8x2x256xf32, #tpu.memory_space<vmem>>, vector<1x2x256xf32>
    %113 = vector.shape_cast %112 : vector<1x2x256xf32> to vector<2x256xf32>
    %cst_38 = arith.constant dense<0.000000e+00> : vector<2x256xf32>
    %114 = tpu.matmul %106, %9, %cst_38 {dimension_numbers = #tpu.dot_dimension_numbers<[1], [0], [0], [1], [0, 0, 1, 1], [], []>} : vector<2x64xf32>, vector<64x256xf32>, vector<2x256xf32> -> vector<2x256xf32>
    %115 = arith.addf %113, %114 : vector<2x256xf32>
    %116 = vector.extract_strided_slice %115 {offsets = [0, 0], sizes = [2, 192], strides = [1, 1]} : vector<2x256xf32> to vector<2x192xf32>
    %117 = arith.negf %116 : vector<2x192xf32>
    %118 = math.exp %117 : vector<2x192xf32>
    %cst_39 = arith.constant 1.000000e+00 : f32
    %119 = vector.broadcast %cst_39 : f32 to vector<2x192xf32>
    %120 = arith.addf %119, %118 : vector<2x192xf32>
    %121 = arith.divf %119, %120 : vector<2x192xf32>
    %122 = vector.extract_strided_slice %115 {offsets = [0, 192], sizes = [2, 64], strides = [1, 1]} : vector<2x256xf32> to vector<2x64xf32>
    %123 = math.tanh %122 : vector<2x64xf32>
    %124 = vector.extract_strided_slice %121 {offsets = [0, 64], sizes = [2, 64], strides = [1, 1]} : vector<2x192xf32> to vector<2x64xf32>
    %125 = arith.mulf %124, %103 : vector<2x64xf32>
    %126 = vector.extract_strided_slice %121 {offsets = [0, 0], sizes = [2, 64], strides = [1, 1]} : vector<2x192xf32> to vector<2x64xf32>
    %127 = arith.mulf %126, %123 : vector<2x64xf32>
    %128 = arith.addf %125, %127 : vector<2x64xf32>
    %129 = vector.extract_strided_slice %121 {offsets = [0, 128], sizes = [2, 64], strides = [1, 1]} : vector<2x192xf32> to vector<2x64xf32>
    %130 = math.tanh %128 : vector<2x64xf32>
    %131 = arith.mulf %129, %130 : vector<2x64xf32>
    %132 = arith.index_cast %c4_i32 : i32 to index
    %c0_40 = arith.constant 0 : index
    %c0_41 = arith.constant 0 : index
    %133 = vector.load %arg18[%132, %c0_40, %c0_41] : memref<8x2x64xf32, #tpu.memory_space<vmem>>, vector<1x2x64xf32>
    %134 = vector.shape_cast %133 : vector<1x2x64xf32> to vector<2x64xf32>
    %135 = vector.shape_cast %131 : vector<2x64xf32> to vector<1x2x64xf32>
    tpu.vector_store %arg18[%132, %c0_40, %c0_41], %135 {strides = array<i32>} : memref<8x2x64xf32, #tpu.memory_space<vmem>>, vector<1x2x64xf32>,
    %c5_i32 = arith.constant 5 : i32
    %136 = arith.index_cast %c5_i32 : i32 to index
    %c0_42 = arith.constant 0 : index
    %c0_43 = arith.constant 0 : index
    %137 = vector.load %arg15[%136, %c0_42, %c0_43] : memref<8x2x256xf32, #tpu.memory_space<vmem>>, vector<1x2x256xf32>
    %138 = vector.shape_cast %137 : vector<1x2x256xf32> to vector<2x256xf32>
    %cst_44 = arith.constant dense<0.000000e+00> : vector<2x256xf32>
    %139 = tpu.matmul %131, %9, %cst_44 {dimension_numbers = #tpu.dot_dimension_numbers<[1], [0], [0], [1], [0, 0, 1, 1], [], []>} : vector<2x64xf32>, vector<64x256xf32>, vector<2x256xf32> -> vector<2x256xf32>
    %140 = arith.addf %138, %139 : vector<2x256xf32>
    %141 = vector.extract_strided_slice %140 {offsets = [0, 0], sizes = [2, 192], strides = [1, 1]} : vector<2x256xf32> to vector<2x192xf32>
    %142 = arith.negf %141 : vector<2x192xf32>
    %143 = math.exp %142 : vector<2x192xf32>
    %cst_45 = arith.constant 1.000000e+00 : f32
    %144 = vector.broadcast %cst_45 : f32 to vector<2x192xf32>
    %145 = arith.addf %144, %143 : vector<2x192xf32>
    %146 = arith.divf %144, %145 : vector<2x192xf32>
    %147 = vector.extract_strided_slice %140 {offsets = [0, 192], sizes = [2, 64], strides = [1, 1]} : vector<2x256xf32> to vector<2x64xf32>
    %148 = math.tanh %147 : vector<2x64xf32>
    %149 = vector.extract_strided_slice %146 {offsets = [0, 64], sizes = [2, 64], strides = [1, 1]} : vector<2x192xf32> to vector<2x64xf32>
    %150 = arith.mulf %149, %128 : vector<2x64xf32>
    %151 = vector.extract_strided_slice %146 {offsets = [0, 0], sizes = [2, 64], strides = [1, 1]} : vector<2x192xf32> to vector<2x64xf32>
    %152 = arith.mulf %151, %148 : vector<2x64xf32>
    %153 = arith.addf %150, %152 : vector<2x64xf32>
    %154 = vector.extract_strided_slice %146 {offsets = [0, 128], sizes = [2, 64], strides = [1, 1]} : vector<2x192xf32> to vector<2x64xf32>
    %155 = math.tanh %153 : vector<2x64xf32>
    %156 = arith.mulf %154, %155 : vector<2x64xf32>
    %157 = arith.index_cast %c5_i32 : i32 to index
    %c0_46 = arith.constant 0 : index
    %c0_47 = arith.constant 0 : index
    %158 = vector.load %arg18[%157, %c0_46, %c0_47] : memref<8x2x64xf32, #tpu.memory_space<vmem>>, vector<1x2x64xf32>
    %159 = vector.shape_cast %158 : vector<1x2x64xf32> to vector<2x64xf32>
    %160 = vector.shape_cast %156 : vector<2x64xf32> to vector<1x2x64xf32>
    tpu.vector_store %arg18[%157, %c0_46, %c0_47], %160 {strides = array<i32>} : memref<8x2x64xf32, #tpu.memory_space<vmem>>, vector<1x2x64xf32>,
    %c6_i32 = arith.constant 6 : i32
    %161 = arith.index_cast %c6_i32 : i32 to index
    %c0_48 = arith.constant 0 : index
    %c0_49 = arith.constant 0 : index
    %162 = vector.load %arg15[%161, %c0_48, %c0_49] : memref<8x2x256xf32, #tpu.memory_space<vmem>>, vector<1x2x256xf32>
    %163 = vector.shape_cast %162 : vector<1x2x256xf32> to vector<2x256xf32>
    %cst_50 = arith.constant dense<0.000000e+00> : vector<2x256xf32>
    %164 = tpu.matmul %156, %9, %cst_50 {dimension_numbers = #tpu.dot_dimension_numbers<[1], [0], [0], [1], [0, 0, 1, 1], [], []>} : vector<2x64xf32>, vector<64x256xf32>, vector<2x256xf32> -> vector<2x256xf32>
    %165 = arith.addf %163, %164 : vector<2x256xf32>
    %166 = vector.extract_strided_slice %165 {offsets = [0, 0], sizes = [2, 192], strides = [1, 1]} : vector<2x256xf32> to vector<2x192xf32>
    %167 = arith.negf %166 : vector<2x192xf32>
    %168 = math.exp %167 : vector<2x192xf32>
    %cst_51 = arith.constant 1.000000e+00 : f32
    %169 = vector.broadcast %cst_51 : f32 to vector<2x192xf32>
    %170 = arith.addf %169, %168 : vector<2x192xf32>
    %171 = arith.divf %169, %170 : vector<2x192xf32>
    %172 = vector.extract_strided_slice %165 {offsets = [0, 192], sizes = [2, 64], strides = [1, 1]} : vector<2x256xf32> to vector<2x64xf32>
    %173 = math.tanh %172 : vector<2x64xf32>
    %174 = vector.extract_strided_slice %171 {offsets = [0, 64], sizes = [2, 64], strides = [1, 1]} : vector<2x192xf32> to vector<2x64xf32>
    %175 = arith.mulf %174, %153 : vector<2x64xf32>
    %176 = vector.extract_strided_slice %171 {offsets = [0, 0], sizes = [2, 64], strides = [1, 1]} : vector<2x192xf32> to vector<2x64xf32>
    %177 = arith.mulf %176, %173 : vector<2x64xf32>
    %178 = arith.addf %175, %177 : vector<2x64xf32>
    %179 = vector.extract_strided_slice %171 {offsets = [0, 128], sizes = [2, 64], strides = [1, 1]} : vector<2x192xf32> to vector<2x64xf32>
    %180 = math.tanh %178 : vector<2x64xf32>
    %181 = arith.mulf %179, %180 : vector<2x64xf32>
    %182 = arith.index_cast %c6_i32 : i32 to index
    %c0_52 = arith.constant 0 : index
    %c0_53 = arith.constant 0 : index
    %183 = vector.load %arg18[%182, %c0_52, %c0_53] : memref<8x2x64xf32, #tpu.memory_space<vmem>>, vector<1x2x64xf32>
    %184 = vector.shape_cast %183 : vector<1x2x64xf32> to vector<2x64xf32>
    %185 = vector.shape_cast %181 : vector<2x64xf32> to vector<1x2x64xf32>
    tpu.vector_store %arg18[%182, %c0_52, %c0_53], %185 {strides = array<i32>} : memref<8x2x64xf32, #tpu.memory_space<vmem>>, vector<1x2x64xf32>,
    %c7_i32 = arith.constant 7 : i32
    %186 = arith.index_cast %c7_i32 : i32 to index
    %c0_54 = arith.constant 0 : index
    %c0_55 = arith.constant 0 : index
    %187 = vector.load %arg15[%186, %c0_54, %c0_55] : memref<8x2x256xf32, #tpu.memory_space<vmem>>, vector<1x2x256xf32>
    %188 = vector.shape_cast %187 : vector<1x2x256xf32> to vector<2x256xf32>
    %cst_56 = arith.constant dense<0.000000e+00> : vector<2x256xf32>
    %189 = tpu.matmul %181, %9, %cst_56 {dimension_numbers = #tpu.dot_dimension_numbers<[1], [0], [0], [1], [0, 0, 1, 1], [], []>} : vector<2x64xf32>, vector<64x256xf32>, vector<2x256xf32> -> vector<2x256xf32>
    %190 = arith.addf %188, %189 : vector<2x256xf32>
    %191 = vector.extract_strided_slice %190 {offsets = [0, 0], sizes = [2, 192], strides = [1, 1]} : vector<2x256xf32> to vector<2x192xf32>
    %192 = arith.negf %191 : vector<2x192xf32>
    %193 = math.exp %192 : vector<2x192xf32>
    %cst_57 = arith.constant 1.000000e+00 : f32
    %194 = vector.broadcast %cst_57 : f32 to vector<2x192xf32>
    %195 = arith.addf %194, %193 : vector<2x192xf32>
    %196 = arith.divf %194, %195 : vector<2x192xf32>
    %197 = vector.extract_strided_slice %190 {offsets = [0, 192], sizes = [2, 64], strides = [1, 1]} : vector<2x256xf32> to vector<2x64xf32>
    %198 = math.tanh %197 : vector<2x64xf32>
    %199 = vector.extract_strided_slice %196 {offsets = [0, 64], sizes = [2, 64], strides = [1, 1]} : vector<2x192xf32> to vector<2x64xf32>
    %200 = arith.mulf %199, %178 : vector<2x64xf32>
    %201 = vector.extract_strided_slice %196 {offsets = [0, 0], sizes = [2, 64], strides = [1, 1]} : vector<2x192xf32> to vector<2x64xf32>
    %202 = arith.mulf %201, %198 : vector<2x64xf32>
    %203 = arith.addf %200, %202 : vector<2x64xf32>
    %204 = vector.extract_strided_slice %196 {offsets = [0, 128], sizes = [2, 64], strides = [1, 1]} : vector<2x192xf32> to vector<2x64xf32>
    %205 = math.tanh %203 : vector<2x64xf32>
    %206 = arith.mulf %204, %205 : vector<2x64xf32>
    %207 = arith.index_cast %c7_i32 : i32 to index
    %c0_58 = arith.constant 0 : index
    %c0_59 = arith.constant 0 : index
    %208 = vector.load %arg18[%207, %c0_58, %c0_59] : memref<8x2x64xf32, #tpu.memory_space<vmem>>, vector<1x2x64xf32>
    %209 = vector.shape_cast %208 : vector<1x2x64xf32> to vector<2x64xf32>
    %210 = vector.shape_cast %206 : vector<2x64xf32> to vector<1x2x64xf32>
    tpu.vector_store %arg18[%207, %c0_58, %c0_59], %210 {strides = array<i32>} : memref<8x2x64xf32, #tpu.memory_space<vmem>>, vector<1x2x64xf32>,
    %c8_i32 = arith.constant 8 : i32
    %c0_60 = arith.constant 0 : index
    %c0_61 = arith.constant 0 : index
    %c0_62 = arith.constant 0 : index
    %211 = vector.load %arg18[%c0_60, %c0_61, %c0_62] : memref<8x2x64xf32, #tpu.memory_space<vmem>>, vector<8x2x64xf32>
    %212 = vector.shape_cast %211 : vector<8x2x64xf32> to vector<16x64xf32>
    %c0_63 = arith.constant 0 : index
    %c0_64 = arith.constant 0 : index
    %213 = vector.load %arg4[%c0_63, %c0_64] : memref<64x128xf32, #tpu.memory_space<vmem>>, vector<64x128xf32>
    %cst_65 = arith.constant dense<0.000000e+00> : vector<16x128xf32>
    %214 = tpu.matmul %212, %213, %cst_65 {dimension_numbers = #tpu.dot_dimension_numbers<[1], [0], [0], [1], [0, 0, 1, 1], [], []>} : vector<16x64xf32>, vector<64x128xf32>, vector<16x128xf32> -> vector<16x128xf32>
    %c0_66 = arith.constant 0 : index
    %c0_67 = arith.constant 0 : index
    %215 = vector.load %arg7[%c0_66, %c0_67] : memref<1x128xf32, #tpu.memory_space<vmem>>, vector<1x128xf32>
    %216 = vector.broadcast %215 : vector<1x128xf32> to vector<16x128xf32>
    %217 = arith.addf %214, %216 : vector<16x128xf32>
    %218 = vector.shape_cast %217 : vector<16x128xf32> to vector<8x2x128xf32>
    %c0_68 = arith.constant 0 : index
    %c0_69 = arith.constant 0 : index
    %c0_70 = arith.constant 0 : index
    %219 = vector.load %arg16[%c0_68, %c0_69, %c0_70] : memref<8x2x128xf32, #tpu.memory_space<vmem>>, vector<8x2x128xf32>
    tpu.vector_store %arg16[%c0_68, %c0_69, %c0_70], %218 {strides = array<i32>} : memref<8x2x128xf32, #tpu.memory_space<vmem>>, vector<8x2x128xf32>,
    %c0_71 = arith.constant 0 : index
    %c0_72 = arith.constant 0 : index
    %220 = vector.load %arg5[%c0_71, %c0_72] : memref<64x128xf32, #tpu.memory_space<vmem>>, vector<64x128xf32>
    %cst_73 = arith.constant dense<0.000000e+00> : vector<16x128xf32>
    %221 = tpu.matmul %212, %220, %cst_73 {dimension_numbers = #tpu.dot_dimension_numbers<[1], [0], [0], [1], [0, 0, 1, 1], [], []>} : vector<16x64xf32>, vector<64x128xf32>, vector<16x128xf32> -> vector<16x128xf32>
    %222 = vector.shape_cast %221 : vector<16x128xf32> to vector<8x2x128xf32>
    %c0_74 = arith.constant 0 : index
    %c0_75 = arith.constant 0 : index
    %c0_76 = arith.constant 0 : index
    %223 = vector.load %arg17[%c0_74, %c0_75, %c0_76] : memref<8x2x128xf32, #tpu.memory_space<vmem>>, vector<8x2x128xf32>
    tpu.vector_store %arg17[%c0_74, %c0_75, %c0_76], %222 {strides = array<i32>} : memref<8x2x128xf32, #tpu.memory_space<vmem>>, vector<8x2x128xf32>,
    %c0_77 = arith.constant 0 : index
    %c0_78 = arith.constant 0 : index
    %224 = vector.load %arg6[%c0_77, %c0_78] : memref<32x128xf32, #tpu.memory_space<vmem>>, vector<32x128xf32>
    %cst_79 = arith.constant 0.000000e+00 : f32
    %225 = vector.broadcast %cst_79 : f32 to vector<2x32xf32>
    %c0_i32_80 = arith.constant 0 : i32
    %226 = arith.index_cast %c0_i32_80 : i32 to index
    %c0_81 = arith.constant 0 : index
    %c0_82 = arith.constant 0 : index
    %227 = vector.load %arg16[%226, %c0_81, %c0_82] : memref<8x2x128xf32, #tpu.memory_space<vmem>>, vector<1x2x128xf32>
    %228 = vector.shape_cast %227 : vector<1x2x128xf32> to vector<2x128xf32>
    %c7_i32_83 = arith.constant 7 : i32
    %229 = arith.subi %c7_i32_83, %c0_i32_80 : i32
    %230 = arith.index_cast %229 : i32 to index
    %c0_84 = arith.constant 0 : index
    %c0_85 = arith.constant 0 : index
    %231 = vector.load %arg17[%230, %c0_84, %c0_85] : memref<8x2x128xf32, #tpu.memory_space<vmem>>, vector<1x2x128xf32>
    %232 = vector.shape_cast %231 : vector<1x2x128xf32> to vector<2x128xf32>
    %233 = arith.addf %228, %232 : vector<2x128xf32>
    %cst_86 = arith.constant dense<0.000000e+00> : vector<2x128xf32>
    %234 = tpu.matmul %225, %224, %cst_86 {dimension_numbers = #tpu.dot_dimension_numbers<[1], [0], [0], [1], [0, 0, 1, 1], [], []>} : vector<2x32xf32>, vector<32x128xf32>, vector<2x128xf32> -> vector<2x128xf32>
    %235 = arith.addf %233, %234 : vector<2x128xf32>
    %236 = vector.extract_strided_slice %235 {offsets = [0, 0], sizes = [2, 96], strides = [1, 1]} : vector<2x128xf32> to vector<2x96xf32>
    %237 = arith.negf %236 : vector<2x96xf32>
    %238 = math.exp %237 : vector<2x96xf32>
    %cst_87 = arith.constant 1.000000e+00 : f32
    %239 = vector.broadcast %cst_87 : f32 to vector<2x96xf32>
    %240 = arith.addf %239, %238 : vector<2x96xf32>
    %241 = arith.divf %239, %240 : vector<2x96xf32>
    %242 = vector.extract_strided_slice %235 {offsets = [0, 96], sizes = [2, 32], strides = [1, 1]} : vector<2x128xf32> to vector<2x32xf32>
    %243 = math.tanh %242 : vector<2x32xf32>
    %244 = vector.extract_strided_slice %241 {offsets = [0, 32], sizes = [2, 32], strides = [1, 1]} : vector<2x96xf32> to vector<2x32xf32>
    %245 = arith.mulf %244, %225 : vector<2x32xf32>
    %246 = vector.extract_strided_slice %241 {offsets = [0, 0], sizes = [2, 32], strides = [1, 1]} : vector<2x96xf32> to vector<2x32xf32>
    %247 = arith.mulf %246, %243 : vector<2x32xf32>
    %248 = arith.addf %245, %247 : vector<2x32xf32>
    %249 = vector.extract_strided_slice %241 {offsets = [0, 64], sizes = [2, 32], strides = [1, 1]} : vector<2x96xf32> to vector<2x32xf32>
    %250 = math.tanh %248 : vector<2x32xf32>
    %251 = arith.mulf %249, %250 : vector<2x32xf32>
    %c1_i32_88 = arith.constant 1 : i32
    %252 = arith.index_cast %c1_i32_88 : i32 to index
    %c0_89 = arith.constant 0 : index
    %c0_90 = arith.constant 0 : index
    %253 = vector.load %arg16[%252, %c0_89, %c0_90] : memref<8x2x128xf32, #tpu.memory_space<vmem>>, vector<1x2x128xf32>
    %254 = vector.shape_cast %253 : vector<1x2x128xf32> to vector<2x128xf32>
    %c7_i32_91 = arith.constant 7 : i32
    %255 = arith.subi %c7_i32_91, %c1_i32_88 : i32
    %256 = arith.index_cast %255 : i32 to index
    %c0_92 = arith.constant 0 : index
    %c0_93 = arith.constant 0 : index
    %257 = vector.load %arg17[%256, %c0_92, %c0_93] : memref<8x2x128xf32, #tpu.memory_space<vmem>>, vector<1x2x128xf32>
    %258 = vector.shape_cast %257 : vector<1x2x128xf32> to vector<2x128xf32>
    %259 = arith.addf %254, %258 : vector<2x128xf32>
    %cst_94 = arith.constant dense<0.000000e+00> : vector<2x128xf32>
    %260 = tpu.matmul %251, %224, %cst_94 {dimension_numbers = #tpu.dot_dimension_numbers<[1], [0], [0], [1], [0, 0, 1, 1], [], []>} : vector<2x32xf32>, vector<32x128xf32>, vector<2x128xf32> -> vector<2x128xf32>
    %261 = arith.addf %259, %260 : vector<2x128xf32>
    %262 = vector.extract_strided_slice %261 {offsets = [0, 0], sizes = [2, 96], strides = [1, 1]} : vector<2x128xf32> to vector<2x96xf32>
    %263 = arith.negf %262 : vector<2x96xf32>
    %264 = math.exp %263 : vector<2x96xf32>
    %cst_95 = arith.constant 1.000000e+00 : f32
    %265 = vector.broadcast %cst_95 : f32 to vector<2x96xf32>
    %266 = arith.addf %265, %264 : vector<2x96xf32>
    %267 = arith.divf %265, %266 : vector<2x96xf32>
    %268 = vector.extract_strided_slice %261 {offsets = [0, 96], sizes = [2, 32], strides = [1, 1]} : vector<2x128xf32> to vector<2x32xf32>
    %269 = math.tanh %268 : vector<2x32xf32>
    %270 = vector.extract_strided_slice %267 {offsets = [0, 32], sizes = [2, 32], strides = [1, 1]} : vector<2x96xf32> to vector<2x32xf32>
    %271 = arith.mulf %270, %248 : vector<2x32xf32>
    %272 = vector.extract_strided_slice %267 {offsets = [0, 0], sizes = [2, 32], strides = [1, 1]} : vector<2x96xf32> to vector<2x32xf32>
    %273 = arith.mulf %272, %269 : vector<2x32xf32>
    %274 = arith.addf %271, %273 : vector<2x32xf32>
    %275 = vector.extract_strided_slice %267 {offsets = [0, 64], sizes = [2, 32], strides = [1, 1]} : vector<2x96xf32> to vector<2x32xf32>
    %276 = math.tanh %274 : vector<2x32xf32>
    %277 = arith.mulf %275, %276 : vector<2x32xf32>
    %c2_i32_96 = arith.constant 2 : i32
    %278 = arith.index_cast %c2_i32_96 : i32 to index
    %c0_97 = arith.constant 0 : index
    %c0_98 = arith.constant 0 : index
    %279 = vector.load %arg16[%278, %c0_97, %c0_98] : memref<8x2x128xf32, #tpu.memory_space<vmem>>, vector<1x2x128xf32>
    %280 = vector.shape_cast %279 : vector<1x2x128xf32> to vector<2x128xf32>
    %c7_i32_99 = arith.constant 7 : i32
    %281 = arith.subi %c7_i32_99, %c2_i32_96 : i32
    %282 = arith.index_cast %281 : i32 to index
    %c0_100 = arith.constant 0 : index
    %c0_101 = arith.constant 0 : index
    %283 = vector.load %arg17[%282, %c0_100, %c0_101] : memref<8x2x128xf32, #tpu.memory_space<vmem>>, vector<1x2x128xf32>
    %284 = vector.shape_cast %283 : vector<1x2x128xf32> to vector<2x128xf32>
    %285 = arith.addf %280, %284 : vector<2x128xf32>
    %cst_102 = arith.constant dense<0.000000e+00> : vector<2x128xf32>
    %286 = tpu.matmul %277, %224, %cst_102 {dimension_numbers = #tpu.dot_dimension_numbers<[1], [0], [0], [1], [0, 0, 1, 1], [], []>} : vector<2x32xf32>, vector<32x128xf32>, vector<2x128xf32> -> vector<2x128xf32>
    %287 = arith.addf %285, %286 : vector<2x128xf32>
    %288 = vector.extract_strided_slice %287 {offsets = [0, 0], sizes = [2, 96], strides = [1, 1]} : vector<2x128xf32> to vector<2x96xf32>
    %289 = arith.negf %288 : vector<2x96xf32>
    %290 = math.exp %289 : vector<2x96xf32>
    %cst_103 = arith.constant 1.000000e+00 : f32
    %291 = vector.broadcast %cst_103 : f32 to vector<2x96xf32>
    %292 = arith.addf %291, %290 : vector<2x96xf32>
    %293 = arith.divf %291, %292 : vector<2x96xf32>
    %294 = vector.extract_strided_slice %287 {offsets = [0, 96], sizes = [2, 32], strides = [1, 1]} : vector<2x128xf32> to vector<2x32xf32>
    %295 = math.tanh %294 : vector<2x32xf32>
    %296 = vector.extract_strided_slice %293 {offsets = [0, 32], sizes = [2, 32], strides = [1, 1]} : vector<2x96xf32> to vector<2x32xf32>
    %297 = arith.mulf %296, %274 : vector<2x32xf32>
    %298 = vector.extract_strided_slice %293 {offsets = [0, 0], sizes = [2, 32], strides = [1, 1]} : vector<2x96xf32> to vector<2x32xf32>
    %299 = arith.mulf %298, %295 : vector<2x32xf32>
    %300 = arith.addf %297, %299 : vector<2x32xf32>
    %301 = vector.extract_strided_slice %293 {offsets = [0, 64], sizes = [2, 32], strides = [1, 1]} : vector<2x96xf32> to vector<2x32xf32>
    %302 = math.tanh %300 : vector<2x32xf32>
    %303 = arith.mulf %301, %302 : vector<2x32xf32>
    %c3_i32_104 = arith.constant 3 : i32
    %304 = arith.index_cast %c3_i32_104 : i32 to index
    %c0_105 = arith.constant 0 : index
    %c0_106 = arith.constant 0 : index
    %305 = vector.load %arg16[%304, %c0_105, %c0_106] : memref<8x2x128xf32, #tpu.memory_space<vmem>>, vector<1x2x128xf32>
    %306 = vector.shape_cast %305 : vector<1x2x128xf32> to vector<2x128xf32>
    %c7_i32_107 = arith.constant 7 : i32
    %307 = arith.subi %c7_i32_107, %c3_i32_104 : i32
    %308 = arith.index_cast %307 : i32 to index
    %c0_108 = arith.constant 0 : index
    %c0_109 = arith.constant 0 : index
    %309 = vector.load %arg17[%308, %c0_108, %c0_109] : memref<8x2x128xf32, #tpu.memory_space<vmem>>, vector<1x2x128xf32>
    %310 = vector.shape_cast %309 : vector<1x2x128xf32> to vector<2x128xf32>
    %311 = arith.addf %306, %310 : vector<2x128xf32>
    %cst_110 = arith.constant dense<0.000000e+00> : vector<2x128xf32>
    %312 = tpu.matmul %303, %224, %cst_110 {dimension_numbers = #tpu.dot_dimension_numbers<[1], [0], [0], [1], [0, 0, 1, 1], [], []>} : vector<2x32xf32>, vector<32x128xf32>, vector<2x128xf32> -> vector<2x128xf32>
    %313 = arith.addf %311, %312 : vector<2x128xf32>
    %314 = vector.extract_strided_slice %313 {offsets = [0, 0], sizes = [2, 96], strides = [1, 1]} : vector<2x128xf32> to vector<2x96xf32>
    %315 = arith.negf %314 : vector<2x96xf32>
    %316 = math.exp %315 : vector<2x96xf32>
    %cst_111 = arith.constant 1.000000e+00 : f32
    %317 = vector.broadcast %cst_111 : f32 to vector<2x96xf32>
    %318 = arith.addf %317, %316 : vector<2x96xf32>
    %319 = arith.divf %317, %318 : vector<2x96xf32>
    %320 = vector.extract_strided_slice %313 {offsets = [0, 96], sizes = [2, 32], strides = [1, 1]} : vector<2x128xf32> to vector<2x32xf32>
    %321 = math.tanh %320 : vector<2x32xf32>
    %322 = vector.extract_strided_slice %319 {offsets = [0, 32], sizes = [2, 32], strides = [1, 1]} : vector<2x96xf32> to vector<2x32xf32>
    %323 = arith.mulf %322, %300 : vector<2x32xf32>
    %324 = vector.extract_strided_slice %319 {offsets = [0, 0], sizes = [2, 32], strides = [1, 1]} : vector<2x96xf32> to vector<2x32xf32>
    %325 = arith.mulf %324, %321 : vector<2x32xf32>
    %326 = arith.addf %323, %325 : vector<2x32xf32>
    %327 = vector.extract_strided_slice %319 {offsets = [0, 64], sizes = [2, 32], strides = [1, 1]} : vector<2x96xf32> to vector<2x32xf32>
    %328 = math.tanh %326 : vector<2x32xf32>
    %329 = arith.mulf %327, %328 : vector<2x32xf32>
    %c4_i32_112 = arith.constant 4 : i32
    %330 = arith.index_cast %c4_i32_112 : i32 to index
    %c0_113 = arith.constant 0 : index
    %c0_114 = arith.constant 0 : index
    %331 = vector.load %arg16[%330, %c0_113, %c0_114] : memref<8x2x128xf32, #tpu.memory_space<vmem>>, vector<1x2x128xf32>
    %332 = vector.shape_cast %331 : vector<1x2x128xf32> to vector<2x128xf32>
    %c7_i32_115 = arith.constant 7 : i32
    %333 = arith.subi %c7_i32_115, %c4_i32_112 : i32
    %334 = arith.index_cast %333 : i32 to index
    %c0_116 = arith.constant 0 : index
    %c0_117 = arith.constant 0 : index
    %335 = vector.load %arg17[%334, %c0_116, %c0_117] : memref<8x2x128xf32, #tpu.memory_space<vmem>>, vector<1x2x128xf32>
    %336 = vector.shape_cast %335 : vector<1x2x128xf32> to vector<2x128xf32>
    %337 = arith.addf %332, %336 : vector<2x128xf32>
    %cst_118 = arith.constant dense<0.000000e+00> : vector<2x128xf32>
    %338 = tpu.matmul %329, %224, %cst_118 {dimension_numbers = #tpu.dot_dimension_numbers<[1], [0], [0], [1], [0, 0, 1, 1], [], []>} : vector<2x32xf32>, vector<32x128xf32>, vector<2x128xf32> -> vector<2x128xf32>
    %339 = arith.addf %337, %338 : vector<2x128xf32>
    %340 = vector.extract_strided_slice %339 {offsets = [0, 0], sizes = [2, 96], strides = [1, 1]} : vector<2x128xf32> to vector<2x96xf32>
    %341 = arith.negf %340 : vector<2x96xf32>
    %342 = math.exp %341 : vector<2x96xf32>
    %cst_119 = arith.constant 1.000000e+00 : f32
    %343 = vector.broadcast %cst_119 : f32 to vector<2x96xf32>
    %344 = arith.addf %343, %342 : vector<2x96xf32>
    %345 = arith.divf %343, %344 : vector<2x96xf32>
    %346 = vector.extract_strided_slice %339 {offsets = [0, 96], sizes = [2, 32], strides = [1, 1]} : vector<2x128xf32> to vector<2x32xf32>
    %347 = math.tanh %346 : vector<2x32xf32>
    %348 = vector.extract_strided_slice %345 {offsets = [0, 32], sizes = [2, 32], strides = [1, 1]} : vector<2x96xf32> to vector<2x32xf32>
    %349 = arith.mulf %348, %326 : vector<2x32xf32>
    %350 = vector.extract_strided_slice %345 {offsets = [0, 0], sizes = [2, 32], strides = [1, 1]} : vector<2x96xf32> to vector<2x32xf32>
    %351 = arith.mulf %350, %347 : vector<2x32xf32>
    %352 = arith.addf %349, %351 : vector<2x32xf32>
    %353 = vector.extract_strided_slice %345 {offsets = [0, 64], sizes = [2, 32], strides = [1, 1]} : vector<2x96xf32> to vector<2x32xf32>
    %354 = math.tanh %352 : vector<2x32xf32>
    %355 = arith.mulf %353, %354 : vector<2x32xf32>
    %c5_i32_120 = arith.constant 5 : i32
    %356 = arith.index_cast %c5_i32_120 : i32 to index
    %c0_121 = arith.constant 0 : index
    %c0_122 = arith.constant 0 : index
    %357 = vector.load %arg16[%356, %c0_121, %c0_122] : memref<8x2x128xf32, #tpu.memory_space<vmem>>, vector<1x2x128xf32>
    %358 = vector.shape_cast %357 : vector<1x2x128xf32> to vector<2x128xf32>
    %c7_i32_123 = arith.constant 7 : i32
    %359 = arith.subi %c7_i32_123, %c5_i32_120 : i32
    %360 = arith.index_cast %359 : i32 to index
    %c0_124 = arith.constant 0 : index
    %c0_125 = arith.constant 0 : index
    %361 = vector.load %arg17[%360, %c0_124, %c0_125] : memref<8x2x128xf32, #tpu.memory_space<vmem>>, vector<1x2x128xf32>
    %362 = vector.shape_cast %361 : vector<1x2x128xf32> to vector<2x128xf32>
    %363 = arith.addf %358, %362 : vector<2x128xf32>
    %cst_126 = arith.constant dense<0.000000e+00> : vector<2x128xf32>
    %364 = tpu.matmul %355, %224, %cst_126 {dimension_numbers = #tpu.dot_dimension_numbers<[1], [0], [0], [1], [0, 0, 1, 1], [], []>} : vector<2x32xf32>, vector<32x128xf32>, vector<2x128xf32> -> vector<2x128xf32>
    %365 = arith.addf %363, %364 : vector<2x128xf32>
    %366 = vector.extract_strided_slice %365 {offsets = [0, 0], sizes = [2, 96], strides = [1, 1]} : vector<2x128xf32> to vector<2x96xf32>
    %367 = arith.negf %366 : vector<2x96xf32>
    %368 = math.exp %367 : vector<2x96xf32>
    %cst_127 = arith.constant 1.000000e+00 : f32
    %369 = vector.broadcast %cst_127 : f32 to vector<2x96xf32>
    %370 = arith.addf %369, %368 : vector<2x96xf32>
    %371 = arith.divf %369, %370 : vector<2x96xf32>
    %372 = vector.extract_strided_slice %365 {offsets = [0, 96], sizes = [2, 32], strides = [1, 1]} : vector<2x128xf32> to vector<2x32xf32>
    %373 = math.tanh %372 : vector<2x32xf32>
    %374 = vector.extract_strided_slice %371 {offsets = [0, 32], sizes = [2, 32], strides = [1, 1]} : vector<2x96xf32> to vector<2x32xf32>
    %375 = arith.mulf %374, %352 : vector<2x32xf32>
    %376 = vector.extract_strided_slice %371 {offsets = [0, 0], sizes = [2, 32], strides = [1, 1]} : vector<2x96xf32> to vector<2x32xf32>
    %377 = arith.mulf %376, %373 : vector<2x32xf32>
    %378 = arith.addf %375, %377 : vector<2x32xf32>
    %379 = vector.extract_strided_slice %371 {offsets = [0, 64], sizes = [2, 32], strides = [1, 1]} : vector<2x96xf32> to vector<2x32xf32>
    %380 = math.tanh %378 : vector<2x32xf32>
    %381 = arith.mulf %379, %380 : vector<2x32xf32>
    %c6_i32_128 = arith.constant 6 : i32
    %382 = arith.index_cast %c6_i32_128 : i32 to index
    %c0_129 = arith.constant 0 : index
    %c0_130 = arith.constant 0 : index
    %383 = vector.load %arg16[%382, %c0_129, %c0_130] : memref<8x2x128xf32, #tpu.memory_space<vmem>>, vector<1x2x128xf32>
    %384 = vector.shape_cast %383 : vector<1x2x128xf32> to vector<2x128xf32>
    %c7_i32_131 = arith.constant 7 : i32
    %385 = arith.subi %c7_i32_131, %c6_i32_128 : i32
    %386 = arith.index_cast %385 : i32 to index
    %c0_132 = arith.constant 0 : index
    %c0_133 = arith.constant 0 : index
    %387 = vector.load %arg17[%386, %c0_132, %c0_133] : memref<8x2x128xf32, #tpu.memory_space<vmem>>, vector<1x2x128xf32>
    %388 = vector.shape_cast %387 : vector<1x2x128xf32> to vector<2x128xf32>
    %389 = arith.addf %384, %388 : vector<2x128xf32>
    %cst_134 = arith.constant dense<0.000000e+00> : vector<2x128xf32>
    %390 = tpu.matmul %381, %224, %cst_134 {dimension_numbers = #tpu.dot_dimension_numbers<[1], [0], [0], [1], [0, 0, 1, 1], [], []>} : vector<2x32xf32>, vector<32x128xf32>, vector<2x128xf32> -> vector<2x128xf32>
    %391 = arith.addf %389, %390 : vector<2x128xf32>
    %392 = vector.extract_strided_slice %391 {offsets = [0, 0], sizes = [2, 96], strides = [1, 1]} : vector<2x128xf32> to vector<2x96xf32>
    %393 = arith.negf %392 : vector<2x96xf32>
    %394 = math.exp %393 : vector<2x96xf32>
    %cst_135 = arith.constant 1.000000e+00 : f32
    %395 = vector.broadcast %cst_135 : f32 to vector<2x96xf32>
    %396 = arith.addf %395, %394 : vector<2x96xf32>
    %397 = arith.divf %395, %396 : vector<2x96xf32>
    %398 = vector.extract_strided_slice %391 {offsets = [0, 96], sizes = [2, 32], strides = [1, 1]} : vector<2x128xf32> to vector<2x32xf32>
    %399 = math.tanh %398 : vector<2x32xf32>
    %400 = vector.extract_strided_slice %397 {offsets = [0, 32], sizes = [2, 32], strides = [1, 1]} : vector<2x96xf32> to vector<2x32xf32>
    %401 = arith.mulf %400, %378 : vector<2x32xf32>
    %402 = vector.extract_strided_slice %397 {offsets = [0, 0], sizes = [2, 32], strides = [1, 1]} : vector<2x96xf32> to vector<2x32xf32>
    %403 = arith.mulf %402, %399 : vector<2x32xf32>
    %404 = arith.addf %401, %403 : vector<2x32xf32>
    %405 = vector.extract_strided_slice %397 {offsets = [0, 64], sizes = [2, 32], strides = [1, 1]} : vector<2x96xf32> to vector<2x32xf32>
    %406 = math.tanh %404 : vector<2x32xf32>
    %407 = arith.mulf %405, %406 : vector<2x32xf32>
    %c7_i32_136 = arith.constant 7 : i32
    %408 = arith.index_cast %c7_i32_136 : i32 to index
    %c0_137 = arith.constant 0 : index
    %c0_138 = arith.constant 0 : index
    %409 = vector.load %arg16[%408, %c0_137, %c0_138] : memref<8x2x128xf32, #tpu.memory_space<vmem>>, vector<1x2x128xf32>
    %410 = vector.shape_cast %409 : vector<1x2x128xf32> to vector<2x128xf32>
    %c7_i32_139 = arith.constant 7 : i32
    %411 = arith.subi %c7_i32_139, %c7_i32_136 : i32
    %412 = arith.index_cast %411 : i32 to index
    %c0_140 = arith.constant 0 : index
    %c0_141 = arith.constant 0 : index
    %413 = vector.load %arg17[%412, %c0_140, %c0_141] : memref<8x2x128xf32, #tpu.memory_space<vmem>>, vector<1x2x128xf32>
    %414 = vector.shape_cast %413 : vector<1x2x128xf32> to vector<2x128xf32>
    %415 = arith.addf %410, %414 : vector<2x128xf32>
    %cst_142 = arith.constant dense<0.000000e+00> : vector<2x128xf32>
    %416 = tpu.matmul %407, %224, %cst_142 {dimension_numbers = #tpu.dot_dimension_numbers<[1], [0], [0], [1], [0, 0, 1, 1], [], []>} : vector<2x32xf32>, vector<32x128xf32>, vector<2x128xf32> -> vector<2x128xf32>
    %417 = arith.addf %415, %416 : vector<2x128xf32>
    %418 = vector.extract_strided_slice %417 {offsets = [0, 0], sizes = [2, 96], strides = [1, 1]} : vector<2x128xf32> to vector<2x96xf32>
    %419 = arith.negf %418 : vector<2x96xf32>
    %420 = math.exp %419 : vector<2x96xf32>
    %cst_143 = arith.constant 1.000000e+00 : f32
    %421 = vector.broadcast %cst_143 : f32 to vector<2x96xf32>
    %422 = arith.addf %421, %420 : vector<2x96xf32>
    %423 = arith.divf %421, %422 : vector<2x96xf32>
    %424 = vector.extract_strided_slice %417 {offsets = [0, 96], sizes = [2, 32], strides = [1, 1]} : vector<2x128xf32> to vector<2x32xf32>
    %425 = math.tanh %424 : vector<2x32xf32>
    %426 = vector.extract_strided_slice %423 {offsets = [0, 32], sizes = [2, 32], strides = [1, 1]} : vector<2x96xf32> to vector<2x32xf32>
    %427 = arith.mulf %426, %404 : vector<2x32xf32>
    %428 = vector.extract_strided_slice %423 {offsets = [0, 0], sizes = [2, 32], strides = [1, 1]} : vector<2x96xf32> to vector<2x32xf32>
    %429 = arith.mulf %428, %425 : vector<2x32xf32>
    %430 = arith.addf %427, %429 : vector<2x32xf32>
    %431 = vector.extract_strided_slice %423 {offsets = [0, 64], sizes = [2, 32], strides = [1, 1]} : vector<2x96xf32> to vector<2x32xf32>
    %432 = math.tanh %430 : vector<2x32xf32>
    %433 = arith.mulf %431, %432 : vector<2x32xf32>
    %c8_i32_144 = arith.constant 8 : i32
    %c7 = arith.constant 7 : index
    %c0_145 = arith.constant 0 : index
    %c0_146 = arith.constant 0 : index
    %434 = vector.load %arg18[%c7, %c0_145, %c0_146] : memref<8x2x64xf32, #tpu.memory_space<vmem>>, vector<1x2x64xf32>
    %435 = vector.shape_cast %434 : vector<1x2x64xf32> to vector<2x64xf32>
    %c0_147 = arith.constant 0 : index
    %c0_148 = arith.constant 0 : index
    %436 = vector.load %arg8[%c0_147, %c0_148] : memref<64x128xf32, #tpu.memory_space<vmem>>, vector<64x128xf32>
    %cst_149 = arith.constant dense<0.000000e+00> : vector<2x128xf32>
    %437 = tpu.matmul %435, %436, %cst_149 {dimension_numbers = #tpu.dot_dimension_numbers<[1], [0], [0], [1], [0, 0, 1, 1], [], []>} : vector<2x64xf32>, vector<64x128xf32>, vector<2x128xf32> -> vector<2x128xf32>
    %c0_150 = arith.constant 0 : index
    %c0_151 = arith.constant 0 : index
    %c0_152 = arith.constant 0 : index
    %438 = vector.load %arg18[%c0_150, %c0_151, %c0_152] : memref<8x2x64xf32, #tpu.memory_space<vmem>>, vector<1x2x64xf32>
    %439 = vector.shape_cast %438 : vector<1x2x64xf32> to vector<2x64xf32>
    %c0_153 = arith.constant 0 : index
    %c0_154 = arith.constant 0 : index
    %440 = vector.load %arg9[%c0_153, %c0_154] : memref<64x128xf32, #tpu.memory_space<vmem>>, vector<64x128xf32>
    %cst_155 = arith.constant dense<0.000000e+00> : vector<2x128xf32>
    %441 = tpu.matmul %439, %440, %cst_155 {dimension_numbers = #tpu.dot_dimension_numbers<[1], [0], [0], [1], [0, 0, 1, 1], [], []>} : vector<2x64xf32>, vector<64x128xf32>, vector<2x128xf32> -> vector<2x128xf32>
    %442 = arith.addf %437, %441 : vector<2x128xf32>
    %c0_156 = arith.constant 0 : index
    %c0_157 = arith.constant 0 : index
    %443 = vector.load %arg10[%c0_156, %c0_157] : memref<1x128xf32, #tpu.memory_space<vmem>>, vector<1x128xf32>
    %444 = vector.broadcast %443 : vector<1x128xf32> to vector<2x128xf32>
    %445 = arith.addf %442, %444 : vector<2x128xf32>
    %446 = vector.extract_strided_slice %445 {offsets = [0, 0], sizes = [2, 96], strides = [1, 1]} : vector<2x128xf32> to vector<2x96xf32>
    %447 = arith.negf %446 : vector<2x96xf32>
    %448 = math.exp %447 : vector<2x96xf32>
    %cst_158 = arith.constant 1.000000e+00 : f32
    %449 = vector.broadcast %cst_158 : f32 to vector<2x96xf32>
    %450 = arith.addf %449, %448 : vector<2x96xf32>
    %451 = arith.divf %449, %450 : vector<2x96xf32>
    %452 = vector.extract_strided_slice %445 {offsets = [0, 96], sizes = [2, 32], strides = [1, 1]} : vector<2x128xf32> to vector<2x32xf32>
    %453 = math.tanh %452 : vector<2x32xf32>
    %454 = vector.extract_strided_slice %451 {offsets = [0, 0], sizes = [2, 32], strides = [1, 1]} : vector<2x96xf32> to vector<2x32xf32>
    %455 = arith.mulf %454, %453 : vector<2x32xf32>
    %456 = vector.extract_strided_slice %451 {offsets = [0, 64], sizes = [2, 32], strides = [1, 1]} : vector<2x96xf32> to vector<2x32xf32>
    %457 = math.tanh %455 : vector<2x32xf32>
    %458 = arith.mulf %456, %457 : vector<2x32xf32>
    %459 = math.tanh %433 : vector<2x32xf32>
    %460 = math.tanh %458 : vector<2x32xf32>
    %461 = tpu.concatenate %459, %460 in 1 : vector<2x32xf32>, vector<2x32xf32> -> vector<2x64xf32>
    %c0_159 = arith.constant 0 : index
    %c0_160 = arith.constant 0 : index
    %462 = vector.load %arg14[%c0_159, %c0_160] : memref<2x64xf32, #tpu.memory_space<vmem>>, vector<2x64xf32>
    tpu.vector_store %arg14[%c0_159, %c0_160], %461 {strides = array<i32>} : memref<2x64xf32, #tpu.memory_space<vmem>>, vector<2x64xf32>,
    %c0_161 = arith.constant 0 : index
    %c0_162 = arith.constant 0 : index
    %463 = vector.load %arg11[%c0_161, %c0_162] : memref<64x5xf32, #tpu.memory_space<vmem>>, vector<64x5xf32>
    %cst_163 = arith.constant dense<0.000000e+00> : vector<2x5xf32>
    %464 = tpu.matmul %461, %463, %cst_163 {dimension_numbers = #tpu.dot_dimension_numbers<[1], [0], [0], [1], [0, 0, 1, 1], [], []>} : vector<2x64xf32>, vector<64x5xf32>, vector<2x5xf32> -> vector<2x5xf32>
    %c0_164 = arith.constant 0 : index
    %c0_165 = arith.constant 0 : index
    %465 = vector.load %arg12[%c0_164, %c0_165] : memref<1x5xf32, #tpu.memory_space<vmem>>, vector<1x5xf32>
    %466 = vector.broadcast %465 : vector<1x5xf32> to vector<2x5xf32>
    %467 = arith.addf %464, %466 : vector<2x5xf32>
    %c0_166 = arith.constant 0 : index
    %c0_167 = arith.constant 0 : index
    %468 = vector.load %arg13[%c0_166, %c0_167] : memref<2x5xf32, #tpu.memory_space<vmem>>, vector<2x5xf32>
    tpu.vector_store %arg13[%c0_166, %c0_167], %467 {strides = array<i32>} : memref<2x5xf32, #tpu.memory_space<vmem>>, vector<2x5xf32>,
    return
  }
}

</mosaic_0001>

<bundles_post_ra>
// kernel: text_rnn_forward.1
= control target key start
LH: loop header
LB: loop body
LE: loop exit
PB: predicated region body
PF: predicated region fallthrough
CT: control target
= control target key end

     0   :  { %20 = vsyncpa [#allocation7], 0  ;;  %v74_v3 = vlaneseq  ;;  %v3496_v8 = vmov 0.0   ;;  %v3497_v9 = vmov 1983009808   ;;  %s4160_s0 = inlined_call_operand.vmem [shape: f32[8,2,64], index: 0, kind: input, shape index: {}]   ;;  %s4161_s1 = inlined_call_operand.vmem [shape: f32[64,256], index: 1, kind: input, shape index: {}]   ;;  %s4162_s2 = inlined_call_operand.vmem [shape: f32[64,256], index: 2, kind: input, shape index: {}]   ;;  %s4163_s3 = inlined_call_operand.vmem [shape: f32[1,256], index: 3, kind: input, shape index: {}]   ;;  %s4164_s4 = inlined_call_operand.vmem [shape: f32[64,128], index: 4, kind: input, shape index: {}]   ;;  %s4165_s5 = inlined_call_operand.vmem [shape: f32[64,128], index: 5, kind: input, shape index: {}]   ;;  %s4166_s6 = inlined_call_operand.vmem [shape: f32[32,128], index: 6, kind: input, shape index: {}]   ;;  %s4167_s7 = inlined_call_operand.vmem [shape: f32[1,128], index: 7, kind: input, shape index: {}]   ;;  %s4168_s8 = inlined_call_operand.vmem [shape: f32[64,128], index: 8, kind: input, shape index: {}]   ;;  %s4169_s9 = inlined_call_operand.vmem [shape: f32[64,128], index: 9, kind: input, shape index: {}]   ;;  %s4170_s10 = inlined_call_operand.vmem [shape: f32[1,128], index: 10, kind: input, shape index: {}]   ;;  %s4171_s11 = inlined_call_operand.vmem [shape: f32[64,5], index: 11, kind: input, shape index: {}]   ;;  %s4172_s12 = inlined_call_operand.vmem [shape: f32[1,5], index: 12, kind: input, shape index: {}]   ;;  %s4173_s13 = inlined_call_operand.hbm [shape: f32[2,5], index: 13, kind: output, shape index: {0}]   ;;  %s4174_s14 = inlined_call_operand.hbm [shape: f32[2,64], index: 14, kind: output, shape index: {1}]  }
   0x1   :  { %v57_v0 = vld [vmem:[%s4161_s1 + $0x8] sm:$0xff]  ;;  %v59_v1 = vld [vmem:[%s4161_s1 + $0x18] sm:$0xff]  ;;  %v56_v2 = vld [vmem:[%s4161_s1] sm:$0xff]  ;;  %195 = vmatprep.mubr.f32.mxu0 %v3496_v8  ;;  %v95_v10 = vunpack.c.l.s4 %v3497_v9  ;;  %348 = vmatprep.mubr.f32.mxu1 %v3496_v8 }
   0x2   :  { %v3039_v4 = vpack.c.bf16 %v59_v1, %v57_v0  ;;  %v58_v5 = vld [vmem:[%s4161_s1 + $0x10] sm:$0xff]  ;;  %v61_v6 = vld [vmem:[%s4161_s1 + $0x28] sm:$0xff]  ;;  %v63_v7 = vld [vmem:[%s4161_s1 + $0x38] sm:$0xff]  ;;  %v3629_v24 = vshrl.u32 %v74_v3, 7 }
   0x3   :  { %v3041_v11 = vpack.c.bf16 %v58_v5, %v56_v2  ;;  %v3043_v12 = vpack.c.bf16 %v63_v7, %v61_v6  ;;  %v60_v13 = vld [vmem:[%s4161_s1 + $0x20] sm:$0xff]  ;;  %v62_v14 = vld [vmem:[%s4161_s1 + $0x30] sm:$0xff]  ;;  %v265_v15 = vld [vmem:[%s4162_s2 + $0x8] sm:$0xff]  ;;  %v96_v25 = vunpack.c.0.s8 %v95_v10 }
   0x4   :  { %3040 = vmatprep.subr.bf16.mxu0 %v3039_v4  ;;  %v267_v16 = vld [vmem:[%s4162_s2 + $0x18] sm:$0xff]  ;;  %v65_v17 = vld [vmem:[%s4161_s1 + $0x48] sm:$0xff]  ;;  %v3045_v19 = vpack.c.bf16 %v62_v14, %v60_v13  ;;  %v264_v21 = vld [vmem:[%s4162_s2] sm:$0xff] }
   0x5   :  { %v67_v18 = vld [vmem:[%s4161_s1 + $0x58] sm:$0xff]  ;;  %3042 = vmatpush1.bf16.msra.mxu0 %v3041_v11  ;;  %v3618_v20 = vpack.c.bf16 %v267_v16, %v265_v15  ;;  %v266_v22 = vld [vmem:[%s4162_s2 + $0x10] sm:$0xff]  ;;  %v64_v23 = vld [vmem:[%s4161_s1 + $0x40] sm:$0xff]  ;;  %v3677_v43 = vsub.s32 %v96_v25, %v3629_v24 }
   0x6   :  { %3044 = vmatprep.subr.bf16.mxu0 %v3043_v12  ;;  %v3047_v26 = vpack.c.bf16 %v67_v18, %v65_v17  ;;  %v3631_v27 = vpack.c.bf16 %v266_v22, %v264_v21  ;;  %v66_v28 = vld [vmem:[%s4161_s1 + $0x50] sm:$0xff]  ;;  %v269_v29 = vld [vmem:[%s4162_s2 + $0x28] sm:$0xff]  ;;  %v271_v30 = vld [vmem:[%s4162_s2 + $0x38] sm:$0xff] }
   0x7   :  { %3056 = vmatprep.subr.bf16.mxu1 %v3618_v20  ;;  %v3643_v31 = vpack.c.bf16 %v271_v30, %v269_v29  ;;  %v69_v32 = vld [vmem:[%s4161_s1 + $0x68] sm:$0xff]  ;;  %v71_v33 = vld [vmem:[%s4161_s1 + $0x78] sm:$0xff]  ;;  %v268_v34 = vld [vmem:[%s4162_s2 + $0x20] sm:$0xff]  ;;  %v3049_v38 = vpack.c.bf16 %v66_v28, %v64_v23 }
   0x8   :  { %3058 = vmatpush1.bf16.msra.mxu1 %v3631_v27  ;;  %v270_v35 = vld [vmem:[%s4162_s2 + $0x30] sm:$0xff]  ;;  %v68_v36 = vld [vmem:[%s4161_s1 + $0x60] sm:$0xff]  ;;  %v273_v40 = vld [vmem:[%s4162_s2 + $0x48] sm:$0xff]  ;;  %v3051_v44 = vpack.c.bf16 %v71_v33, %v69_v32 }
   0x9   :  { %v70_v37 = vld [vmem:[%s4161_s1 + $0x70] sm:$0xff]  ;;  %3046 = vmatpush1.bf16.msra.mxu0 %v3045_v19  ;;  %3060 = vmatprep.subr.bf16.mxu1 %v3643_v31  ;;  %v3665_v39 = vpack.c.bf16 %v270_v35, %v268_v34  ;;  %v275_v41 = vld [vmem:[%s4162_s2 + $0x58] sm:$0xff]  ;;  %v48_v42 = vld [vmem:[%s4160_s0] sm:$0x3] }
   0xa   :  { %3048 = vmatprep.subr.bf16.mxu0 %v3047_v26  ;;  %v3679_v45 = vpack.c.bf16 %v275_v41, %v273_v40  ;;  %v49_v46 = vld [vmem:[%s4160_s0 + $0x2] sm:$0x3]  ;;  %v50_v47 = vld [vmem:[%s4160_s0 + $0x4] sm:$0x3]  ;;  %v51_v48 = vld [vmem:[%s4160_s0 + $0x6] sm:$0x3]  ;;  %v3053_v54 = vpack.c.bf16 %v70_v37, %v68_v36 }
   0xb   :  { %v92_v49 = vcombine.low %v48_v42, %v49_v46  ;;  %v93_v50 = vcombine.low %v50_v47, %v51_v48  ;;  %v272_v51 = vld [vmem:[%s4162_s2 + $0x40] sm:$0xff]  ;;  %v274_v52 = vld [vmem:[%s4162_s2 + $0x50] sm:$0xff]  ;;  %v277_v53 = vld [vmem:[%s4162_s2 + $0x68] sm:$0xff] }
   0xc   :  { %3062 = vmatpush1.bf16.msra.mxu1 %v3665_v39  ;;  %v3700_v55 = vpack.c.bf16 %v274_v52, %v272_v51  ;;  %v279_v56 = vld [vmem:[%s4162_s2 + $0x78] sm:$0xff]  ;;  %v276_v60 = vld [vmem:[%s4162_s2 + $0x60] sm:$0xff]  ;;  %v278_v61 = vld [vmem:[%s4162_s2 + $0x70] sm:$0xff] }
   0xd   :  { %3050 = vmatpush1.bf16.msra.mxu0 %v3049_v38  ;;  %3064 = vmatprep.subr.bf16.mxu1 %v3679_v45  ;;  %v100_v57 = vrot.slane %v92_v49, %v3677_v43  ;;  %v107_v58 = vrot.slane %v93_v50, %v3677_v43  ;;  %v3708_v59 = vpack.c.bf16 %v279_v56, %v277_v53 }
   0xe   :  { %21 = vsyncpa [#allocation9], 0  ;;  %3052 = vmatprep.subr.bf16.mxu0 %v3051_v44  ;;  %v3717_v63 = vpack.c.bf16 %v278_v61, %v276_v60  ;;  %vm126_vm0 = vcmask 523264   ;;  %v76_v0 = vsub.s32 0, %v3629_v24  ;;  %v72_v1 = vld [vmem:[%s4163_s3] sm:$0x3] }
   0xf   :  { %v108_v62 = vcombine.low %v100_v57, %v107_v58  ;;  %v80_v2 = vsub.s32 1, %v3629_v24  ;;  %s3498_s3 = smov 64   ;;  %v52_v33 = vld [vmem:[%s4160_s0 + $0x8] sm:$0x3]  ;;  %v53_v34 = vld [vmem:[%s4160_s0 + $0xa] sm:$0x3] }
  0x10   :  { %3066 = vmatpush1.bf16.msra.mxu1 %v3700_v55  ;;  %v77_v3 = vrot.slane %v72_v1, %v76_v0  ;;  %v54_v35 = vld [vmem:[%s4160_s0 + $0xc] sm:$0x3]  ;;  %v55_v36 = vld [vmem:[%s4160_s0 + $0xe] sm:$0x3]  ;;  %v109_v37 = vcombine.low %v52_v33, %v53_v34  ;;  %vm395_vm1 = vcmask 517120   ;;  %vm3500_vm2 = vmmov 0  }
  0x11   :  { %3054 = vmatpush1.bf16.msra.mxu0 %v3053_v54  ;;  %3068 = vmatprep.subr.bf16.mxu1 %v3708_v59  ;;  %v81_v4 = vrot.slane %v72_v1, %v80_v2  ;;  %v110_v38 = vcombine.low %v54_v35, %v55_v36  ;;  %vm1562_vm3 = vcmask 261120   ;;  %s3502_s29 = smov 96  }
  0x12   :  { %3072 = vmatprep.subr.bf16.mxu0 %v3618_v20  ;;  %v117_v40 = vrot.slane %v109_v37, %v3677_v43 }
  0x13   :  { %v124_v41 = vrot.slane %v110_v38, %v3677_v43 }
  0x14   :  { %2714 = vmatmul.mubr.msk.f32.vlgmr.msra.gmra.mrb[0].mxu0 %vm126_vm0, %v108_v62  ;;  %3070 = vmatpush1.bf16.msra.mxu1 %v3717_v63 }
  0x15   :  { %3074 = vmatpush1.bf16.msra.mxu0 %v3631_v27  ;;  %201 = vmatprep.mubr.f32.mxu0 %v3496_v8  ;;  %v125_v42 = vcombine.low %v117_v40, %v124_v41 }
  0x16   :  { %3076 = vmatprep.subr.bf16.mxu0 %v3643_v31  ;;  %3088 = vmatprep.subr.bf16.mxu1 %v3618_v20 }
  0x17   :  { %349 = vmatmul.mubr.f32.vlgmr.msra.gmra.mrb[0].mxu1 %v3496_v8 }
  0x18   :  { %3090 = vmatpush1.bf16.msra.mxu1 %v3631_v27  ;;  %584 = vmatprep.mubr.f32.mxu1 %v3496_v8 }
  0x19   :  { %3078 = vmatpush1.bf16.msra.mxu0 %v3665_v39  ;;  %3092 = vmatprep.subr.bf16.mxu1 %v3643_v31 }
  0x1a   :  { %3080 = vmatprep.subr.bf16.mxu0 %v3679_v45  ;;  %2715 = vmatmul.mubr.msk.f32.gmra.mrb[2].mxu0 %vm126_vm0, %v125_v42 }
  0x1b   :  { %466 = vmatprep.mubr.f32.mxu0 %v3496_v8 }
  0x1c   :  { %3094 = vmatpush1.bf16.msra.mxu1 %v3665_v39 }
  0x1d   :  { %3082 = vmatpush1.bf16.msra.mxu0 %v3700_v55  ;;  %3096 = vmatprep.subr.bf16.mxu1 %v3679_v45 }
  0x1e   :  { %3084 = vmatprep.subr.bf16.mxu0 %v3708_v59 }
  0x20   :  { %3098 = vmatpush1.bf16.msra.mxu1 %v3700_v55 }
  0x21   :  { %3086 = vmatpush1.bf16.msra.mxu0 %v3717_v63  ;;  %3100 = vmatprep.subr.bf16.mxu1 %v3708_v59 }
  0x22   :  { %3104 = vmatprep.subr.bf16.mxu0 %v3618_v20 }
  0x24   :  { %3102 = vmatpush1.bf16.msra.mxu1 %v3717_v63 }
  0x25   :  { %3120 = vmatprep.subr.bf16.mxu1 %v3618_v20 }
  0xe7   :  { %v197_v5 = vpop.f32.mrb[0].mxu0 }
  0xe8   :  { %v198_v6 = vadd.f32 %v197_v5, %v77_v3  ;;  %v199_v7 = vpop.f32.mrb[1].mxu0 }
  0xe9   :  { %v200_v9 = vadd.f32 %v199_v7, %v81_v4 }
  0xea   :  { %v350_v10 = vpop.f32.mrb[0].mxu1 }
  0xeb   :  { %v212_v11 = vcombine.low %v198_v6, %v200_v9  ;;  %v213_v12 = vcombine.high %v198_v6, %v200_v9  ;;  %v352_v13 = vpop.f32.mrb[1].mxu1 }
  0xec   :  { %v357_v14 = vcombine.low %v350_v10, %v352_v13 }
  0xed   :  { %v220_v15 = vrot.slane %v212_v11, %v3677_v43  ;;  %v227_v16 = vrot.slane %v213_v12, %v3677_v43  ;;  %2716 = vst.sshfl [vmem:[#allocation2] sm:$0x33 pattern:$0x76325410] %v212_v11  ;;  %v203_v49 = vpop.f32.mrb[2].mxu0 }
  0xee   :  { %2717 = vst.sshfl [vmem:[#allocation2 + $0x8] sm:$0x33 pattern:$0x76325410] %v213_v12  ;;  %v364_v19 = vrot.slane %v357_v14, %v3677_v43  ;;  %v204_v50 = vadd.f32 %v203_v49, %v77_v3  ;;  %v205_v51 = vpop.f32.mrb[3].mxu0 }
  0xef   :  { %v228_v17 = vcombine.high %v220_v15, %v220_v15  ;;  %v229_v18 = vcombine.high %v227_v16, %v227_v16  ;;  %v206_v52 = vadd.f32 %v205_v51, %v81_v4 }
  0xf1   :  { %257 = vst [vmem:[#allocation2 + $0x4] sm:$0xf] %v228_v17  ;;  %259 = vst [vmem:[#allocation2 + $0xc] sm:$0xf] %v229_v18  ;;  %v230_v53 = vcombine.low %v204_v50, %v206_v52  ;;  %v231_v54 = vcombine.high %v204_v50, %v206_v52 }
  0xf3   :  { %v238_v56 = vrot.slane %v230_v53, %v3677_v43  ;;  %v245_v57 = vrot.slane %v231_v54, %v3677_v43  ;;  %2718 = vst.sshfl [vmem:[#allocation2 + $0x10] sm:$0x33 pattern:$0x76325410] %v230_v53 }
  0xf4   :  { %v280_v21 = vld [vmem:[#allocation2] sm:$0xf]  ;;  %2719 = vst.sshfl [vmem:[#allocation2 + $0x18] sm:$0x33 pattern:$0x76325410] %v231_v54 }
  0xf5   :  { %v366_v22 = vadd.f32 %v364_v19, %v280_v21  ;;  %v246_v58 = vcombine.high %v238_v56, %v238_v56  ;;  %v247_v60 = vcombine.high %v245_v57, %v245_v57 }
  0xf7   :  { %374 = vrot.lane.b32.xlu0 %v366_v22, %s3498_s3  ;;  %v2720_v23 = vmul.f32 -1.442695, %v366_v22  ;;  %261 = vst [vmem:[#allocation2 + $0x14] sm:$0xf] %v246_v58  ;;  %263 = vst [vmem:[#allocation2 + $0x1c] sm:$0xf] %v247_v60 }
  0xf8   :  { %v398_v5 = vld [vmem:[#allocation2 + $0x4] sm:$0xf]  ;;  %v634_v54 = vld [vmem:[#allocation2 + $0xc] sm:$0xf] }
  0xf9   :  { %3308 = vpow2.f32 %v2720_v23 }
 0x103   :  { %v3309_v24 = vpop.eup %3308 }
 0x104   :  { %v370_v25 = vadd.f32 1.0, %v3309_v24 }
 0x106   :  { %3310 = vrcp.f32 %v370_v25 }
 0x110   :  { %v3311_v29 = vpop.eup %3310 }
 0x111   :  { %v379_v44 = vmul.f32 0.0, %v3311_v29  ;;  %v388_v61 = vrot.slane %v3311_v29, 2 }
 0x169   :  { %v375_v26 = vpop.permute.xlu0 %374 }
 0x16a   :  { %v376_v28 = vrot.slane %v375_v26, 2 }
 0x16c   :  { %3312 = vtanh.f32 %v376_v28 }
 0x176   :  { %v3313_v30 = vpop.eup %3312 }
 0x177   :  { %v380_v32 = vmul.f32 %v3313_v30, %v3311_v29  ;;  %v516_v29 = vld [vmem:[#allocation2 + $0x8] sm:$0xf] }
 0x179   :  { %382 = vrot.lane.b32.xlu0 %v380_v32, %s3498_s3 }
 0x1eb   :  { %v383_v46 = vpop.permute.xlu0 %382 }
 0x1ec   :  { %v385_v47 = vadd.f32 %v383_v46, %v379_v44 }
 0x1ee   :  { %3314 = vtanh.f32 %v385_v47 }
 0x1f8   :  { %v3315_v48 = vpop.eup %3314 }
 0x1f9   :  { %391 = vrot.lane.b32.xlu1 %v3315_v48, %s3498_s3 }
 0x26b   :  { %v392_v62 = vpop.permute.xlu1 %391 }
 0x26c   :  { %v394_v0 = vmul.f32 %v392_v62, %v388_v61 }
 0x26e   :  { %396 = vst.msk [vmem:[#allocation5] sm:$0x3] %vm395_vm1, %v394_v0  ;;  %2721 = vmatmul.mubr.msk.f32.vlgmr.msra.gmra.mrb[4].mxu0 %vm126_vm0, %v394_v0 }
 0x26f   :  { %3106 = vmatpush1.bf16.msra.mxu0 %v3631_v27  ;;  %702 = vmatprep.mubr.f32.mxu0 %v3496_v8 }
 0x270   :  { %3108 = vmatprep.subr.bf16.mxu0 %v3643_v31 }
 0x273   :  { %3110 = vmatpush1.bf16.msra.mxu0 %v3665_v39 }
 0x274   :  { %3112 = vmatprep.subr.bf16.mxu0 %v3679_v45 }
 0x277   :  { %3114 = vmatpush1.bf16.msra.mxu0 %v3700_v55 }
 0x278   :  { %3116 = vmatprep.subr.bf16.mxu0 %v3708_v59 }
 0x27b   :  { %3118 = vmatpush1.bf16.msra.mxu0 %v3717_v63 }
 0x27c   :  { %3136 = vmatprep.subr.bf16.mxu0 %v3618_v20 }
 0x341   :  { %v468_v1 = vpop.f32.mrb[4].mxu0 }
 0x342   :  { %v470_v2 = vpop.f32.mrb[5].mxu0 }
 0x343   :  { %v475_v3 = vcombine.low %v468_v1, %v470_v2 }
 0x345   :  { %v482_v4 = vrot.slane %v475_v3, %v3677_v43 }
 0x347   :  { %v484_v6 = vadd.f32 %v482_v4, %v398_v5 }
 0x349   :  { %492 = vrot.lane.b32.xlu1 %v484_v6, %s3498_s3  ;;  %v2722_v7 = vmul.f32 -1.442695, %v484_v6 }
 0x34b   :  { %3316 = vpow2.f32 %v2722_v7 }
 0x355   :  { %v3317_v9 = vpop.eup %3316 }
 0x356   :  { %v488_v10 = vadd.f32 1.0, %v3317_v9 }
 0x358   :  { %3318 = vrcp.f32 %v488_v10 }
 0x362   :  { %v3319_v13 = vpop.eup %3318 }
 0x363   :  { %v497_v16 = vmul.f32 %v3319_v13, %v385_v47  ;;  %v506_v21 = vrot.slane %v3319_v13, 2 }
 0x3bb   :  { %v493_v11 = vpop.permute.xlu1 %492 }
 0x3bc   :  { %v494_v12 = vrot.slane %v493_v11, 2 }
 0x3be   :  { %3320 = vtanh.f32 %v494_v12 }
 0x3c8   :  { %v3321_v14 = vpop.eup %3320 }
 0x3c9   :  { %v498_v15 = vmul.f32 %v3321_v14, %v3319_v13  ;;  %v752_v14 = vld [vmem:[#allocation2 + $0x10] sm:$0xf] }
 0x3cb   :  { %500 = vrot.lane.b32.xlu0 %v498_v15, %s3498_s3 }
 0x43d   :  { %v501_v17 = vpop.permute.xlu0 %500 }
 0x43e   :  { %v503_v18 = vadd.f32 %v501_v17, %v497_v16 }
 0x440   :  { %3322 = vtanh.f32 %v503_v18 }
 0x44a   :  { %v3323_v19 = vpop.eup %3322 }
 0x44b   :  { %509 = vrot.lane.b32.xlu1 %v3323_v19, %s3498_s3 }
 0x4bd   :  { %v510_v22 = vpop.permute.xlu1 %509 }
 0x4be   :  { %v512_v23 = vmul.f32 %v510_v22, %v506_v21 }
 0x4c0   :  { %514 = vst.msk [vmem:[#allocation5 + $0x2] sm:$0x3] %vm395_vm1, %v512_v23  ;;  %2723 = vmatmul.mubr.msk.f32.vlgmr.msra.gmra.mrb[2].mxu1 %vm126_vm0, %v512_v23 }
 0x4c1   :  { %3122 = vmatpush1.bf16.msra.mxu1 %v3631_v27  ;;  %820 = vmatprep.mubr.f32.mxu1 %v3496_v8 }
 0x4c2   :  { %3124 = vmatprep.subr.bf16.mxu1 %v3643_v31 }
 0x4c5   :  { %3126 = vmatpush1.bf16.msra.mxu1 %v3665_v39 }
 0x4c6   :  { %3128 = vmatprep.subr.bf16.mxu1 %v3679_v45 }
 0x4c9   :  { %3130 = vmatpush1.bf16.msra.mxu1 %v3700_v55 }
 0x4ca   :  { %3132 = vmatprep.subr.bf16.mxu1 %v3708_v59 }
 0x4cd   :  { %3134 = vmatpush1.bf16.msra.mxu1 %v3717_v63 }
 0x4ce   :  { %3152 = vmatprep.subr.bf16.mxu1 %v3618_v20 }
 0x593   :  { %v586_v24 = vpop.f32.mrb[2].mxu1 }
 0x594   :  { %v588_v25 = vpop.f32.mrb[3].mxu1 }
 0x595   :  { %v593_v26 = vcombine.low %v586_v24, %v588_v25 }
 0x597   :  { %v600_v28 = vrot.slane %v593_v26, %v3677_v43 }
 0x599   :  { %v602_v30 = vadd.f32 %v600_v28, %v516_v29 }
 0x59b   :  { %610 = vrot.lane.b32.xlu0 %v602_v30, %s3498_s3  ;;  %v2724_v32 = vmul.f32 -1.442695, %v602_v30 }
 0x59d   :  { %3324 = vpow2.f32 %v2724_v32 }
 0x5a7   :  { %v3325_v33 = vpop.eup %3324 }
 0x5a8   :  { %v606_v34 = vadd.f32 1.0, %v3325_v33 }
 0x5aa   :  { %3326 = vrcp.f32 %v606_v34 }
 0x5b4   :  { %v3327_v37 = vpop.eup %3326 }
 0x5b5   :  { %v615_v41 = vmul.f32 %v3327_v37, %v503_v18  ;;  %v624_v47 = vrot.slane %v3327_v37, 2 }
 0x60d   :  { %v611_v35 = vpop.permute.xlu0 %610 }
 0x60e   :  { %v612_v36 = vrot.slane %v611_v35, 2 }
 0x610   :  { %3328 = vtanh.f32 %v612_v36 }
 0x61a   :  { %v3329_v38 = vpop.eup %3328 }
 0x61b   :  { %v616_v40 = vmul.f32 %v3329_v38, %v3327_v37 }
 0x61d   :  { %618 = vrot.lane.b32.xlu1 %v616_v40, %s3498_s3 }
 0x68f   :  { %v619_v42 = vpop.permute.xlu1 %618 }
 0x690   :  { %v621_v44 = vadd.f32 %v619_v42, %v615_v41 }
 0x692   :  { %3330 = vtanh.f32 %v621_v44 }
 0x69c   :  { %v3331_v46 = vpop.eup %3330 }
 0x69d   :  { %627 = vrot.lane.b32.xlu0 %v3331_v46, %s3498_s3 }
 0x70f   :  { %v628_v48 = vpop.permute.xlu0 %627 }
 0x710   :  { %v630_v49 = vmul.f32 %v628_v48, %v624_v47 }
 0x712   :  { %632 = vst.msk [vmem:[#allocation5 + $0x4] sm:$0x3] %vm395_vm1, %v630_v49  ;;  %2725 = vmatmul.mubr.msk.f32.vlgmr.msra.gmra.mrb[6].mxu0 %vm126_vm0, %v630_v49  ;;  %v1224_v49 = vld [vmem:[#allocation5 + $0x2] sm:$0x3] }
 0x713   :  { %3138 = vmatpush1.bf16.msra.mxu0 %v3631_v27  ;;  %938 = vmatprep.mubr.f32.mxu0 %v3496_v8 }
 0x714   :  { %3140 = vmatprep.subr.bf16.mxu0 %v3643_v31 }
 0x717   :  { %3142 = vmatpush1.bf16.msra.mxu0 %v3665_v39 }
 0x718   :  { %3144 = vmatprep.subr.bf16.mxu0 %v3679_v45 }
 0x71b   :  { %3146 = vmatpush1.bf16.msra.mxu0 %v3700_v55 }
 0x71c   :  { %3148 = vmatprep.subr.bf16.mxu0 %v3708_v59 }
 0x71f   :  { %3150 = vmatpush1.bf16.msra.mxu0 %v3717_v63 }
 0x720   :  { %3168 = vmatprep.subr.bf16.mxu0 %v3618_v20 }
 0x7e5   :  { %v704_v50 = vpop.f32.mrb[6].mxu0 }
 0x7e6   :  { %v706_v51 = vpop.f32.mrb[7].mxu0 }
 0x7e7   :  { %v711_v52 = vcombine.low %v704_v50, %v706_v51  ;;  %v1225_v50 = vld [vmem:[#allocation5 + $0x4] sm:$0x3] }
 0x7e9   :  { %v718_v53 = vrot.slane %v711_v52, %v3677_v43  ;;  %v1223_v52 = vld [vmem:[#allocation5] sm:$0x3] }
 0x7eb   :  { %v720_v56 = vadd.f32 %v718_v53, %v634_v54  ;;  %v1254_v53 = vcombine.low %v1223_v52, %v1224_v49  ;;  %v1424_v52 = vld [vmem:[%s4165_s5 + $0x28] sm:$0xff] }
 0x7ed   :  { %728 = vrot.lane.b32.xlu1 %v720_v56, %s3498_s3  ;;  %v2726_v57 = vmul.f32 -1.442695, %v720_v56 }
 0x7ef   :  { %3332 = vpow2.f32 %v2726_v57 }
 0x7f9   :  { %v3333_v58 = vpop.eup %3332 }
 0x7fa   :  { %v724_v60 = vadd.f32 1.0, %v3333_v58  ;;  %v1262_v58 = vrot.slane %v1254_v53, %v3677_v43  ;;  %v1237_v53 = vld [vmem:[%s4164_s4 + $0x30] sm:$0xff] }
 0x7fc   :  { %3334 = vrcp.f32 %v724_v60 }
 0x806   :  { %v3335_v0 = vpop.eup %3334 }
 0x807   :  { %v733_v2 = vmul.f32 %v3335_v0, %v621_v44  ;;  %v742_v6 = vrot.slane %v3335_v0, 2 }
 0x85f   :  { %v729_v61 = vpop.permute.xlu1 %728 }
 0x860   :  { %v730_v62 = vrot.slane %v729_v61, 2 }
 0x862   :  { %3336 = vtanh.f32 %v730_v62 }
 0x86c   :  { %v3337_v1 = vpop.eup %3336 }
 0x86d   :  { %v734_v20 = vmul.f32 %v3337_v1, %v3335_v0 }
 0x86f   :  { %736 = vrot.lane.b32.xlu0 %v734_v20, %s3498_s3 }
 0x8e1   :  { %v737_v3 = vpop.permute.xlu0 %736 }
 0x8e2   :  { %v739_v4 = vadd.f32 %v737_v3, %v733_v2  ;;  %v988_v2 = vld [vmem:[#allocation2 + $0x18] sm:$0xf] }
 0x8e4   :  { %3338 = vtanh.f32 %v739_v4 }
 0x8ee   :  { %v3339_v5 = vpop.eup %3338 }
 0x8ef   :  { %745 = vrot.lane.b32.xlu1 %v3339_v5, %s3498_s3 }
 0x961   :  { %v746_v7 = vpop.permute.xlu1 %745 }
 0x962   :  { %v748_v9 = vmul.f32 %v746_v7, %v742_v6 }
 0x964   :  { %750 = vst.msk [vmem:[#allocation5 + $0x6] sm:$0x3] %vm395_vm1, %v748_v9  ;;  %2727 = vmatmul.mubr.msk.f32.vlgmr.msra.gmra.mrb[4].mxu1 %vm126_vm0, %v748_v9 }
 0x965   :  { %3154 = vmatpush1.bf16.msra.mxu1 %v3631_v27  ;;  %1056 = vmatprep.mubr.f32.mxu1 %v3496_v8 }
 0x966   :  { %3156 = vmatprep.subr.bf16.mxu1 %v3643_v31 }
 0x969   :  { %3158 = vmatpush1.bf16.msra.mxu1 %v3665_v39 }
 0x96a   :  { %3160 = vmatprep.subr.bf16.mxu1 %v3679_v45 }
 0x96b   :  { %v1226_v48 = vld [vmem:[#allocation5 + $0x6] sm:$0x3] }
 0x96c   :  { %v1255_v51 = vcombine.low %v1225_v50, %v1226_v48  ;;  %v1236_v48 = vld [vmem:[%s4164_s4 + $0x28] sm:$0xff] }
 0x96d   :  { %3162 = vmatpush1.bf16.msra.mxu1 %v3700_v55 }
 0x96e   :  { %3164 = vmatprep.subr.bf16.mxu1 %v3708_v59  ;;  %v1269_v54 = vrot.slane %v1255_v51, %v3677_v43  ;;  %v1423_v51 = vld [vmem:[%s4165_s5 + $0x20] sm:$0xff] }
 0x970   :  { %v1270_v61 = vcombine.low %v1262_v58, %v1269_v54  ;;  %v3207_v54 = vpack.c.bf16 %v1424_v52, %v1423_v51  ;;  %v1426_v58 = vld [vmem:[%s4165_s5 + $0x38] sm:$0xff] }
 0x971   :  { %3166 = vmatpush1.bf16.msra.mxu1 %v3717_v63 }
 0xa37   :  { %v822_v10 = vpop.f32.mrb[4].mxu1 }
 0xa38   :  { %v824_v11 = vpop.f32.mrb[5].mxu1 }
 0xa39   :  { %v829_v12 = vcombine.low %v822_v10, %v824_v11 }
 0xa3b   :  { %v836_v13 = vrot.slane %v829_v12, %v3677_v43 }
 0xa3d   :  { %v838_v15 = vadd.f32 %v836_v13, %v752_v14 }
 0xa3f   :  { %846 = vrot.lane.b32.xlu0 %v838_v15, %s3498_s3  ;;  %v2728_v16 = vmul.f32 -1.442695, %v838_v15 }
 0xa41   :  { %3340 = vpow2.f32 %v2728_v16 }
 0xa4b   :  { %v3341_v17 = vpop.eup %3340 }
 0xa4c   :  { %v842_v18 = vadd.f32 1.0, %v3341_v17 }
 0xa4e   :  { %3342 = vrcp.f32 %v842_v18 }
 0xa58   :  { %v3343_v22 = vpop.eup %3342 }
 0xa59   :  { %v851_v25 = vmul.f32 %v3343_v22, %v739_v4  ;;  %v860_v30 = vrot.slane %v3343_v22, 2 }
 0xab1   :  { %v847_v19 = vpop.permute.xlu0 %846 }
 0xab2   :  { %v848_v21 = vrot.slane %v847_v19, 2 }
 0xab4   :  { %3344 = vtanh.f32 %v848_v21 }
 0xabe   :  { %v3345_v23 = vpop.eup %3344 }
 0xabf   :  { %v852_v24 = vmul.f32 %v3345_v23, %v3343_v22 }
 0xac1   :  { %854 = vrot.lane.b32.xlu1 %v852_v24, %s3498_s3 }
 0xb33   :  { %v855_v26 = vpop.permute.xlu1 %854 }
 0xb34   :  { %v857_v28 = vadd.f32 %v855_v26, %v851_v25  ;;  %v1106_v25 = vld [vmem:[#allocation2 + $0x1c] sm:$0xf] }
 0xb36   :  { %3346 = vtanh.f32 %v857_v28 }
 0xb40   :  { %v3347_v29 = vpop.eup %3346 }
 0xb41   :  { %863 = vrot.lane.b32.xlu0 %v3347_v29, %s3498_s3 }
 0xbb3   :  { %v864_v32 = vpop.permute.xlu0 %863 }
 0xbb4   :  { %v866_v33 = vmul.f32 %v864_v32, %v860_v30 }
 0xbb6   :  { %868 = vst.msk [vmem:[#allocation5 + $0x8] sm:$0x3] %vm395_vm1, %v866_v33  ;;  %2729 = vmatmul.mubr.msk.f32.vlgmr.msra.gmra.mrb[8].mxu0 %vm126_vm0, %v866_v33 }
 0xbb7   :  { %3170 = vmatpush1.bf16.msra.mxu0 %v3631_v27  ;;  %1174 = vmatprep.mubr.f32.mxu0 %v3496_v8  ;;  %v870_v27 = vld [vmem:[#allocation2 + $0x14] sm:$0xf] }
 0xbb8   :  { %3172 = vmatprep.subr.bf16.mxu0 %v3643_v31 }
 0xbbb   :  { %3174 = vmatpush1.bf16.msra.mxu0 %v3665_v39 }
 0xbbc   :  { %3176 = vmatprep.subr.bf16.mxu0 %v3679_v45 }
 0xbbf   :  { %3178 = vmatpush1.bf16.msra.mxu0 %v3700_v55 }
 0xbc0   :  { %3180 = vmatprep.subr.bf16.mxu0 %v3708_v59 }
 0xbc3   :  { %3182 = vmatpush1.bf16.msra.mxu0 %v3717_v63 }
 0xc89   :  { %v940_v34 = vpop.f32.mrb[8].mxu0 }
 0xc8a   :  { %v942_v35 = vpop.f32.mrb[9].mxu0 }
 0xc8b   :  { %v947_v36 = vcombine.low %v940_v34, %v942_v35 }
 0xc8d   :  { %v954_v37 = vrot.slane %v947_v36, %v3677_v43 }
 0xc8f   :  { %v956_v38 = vadd.f32 %v954_v37, %v870_v27  ;;  %v1231_v37 = vld [vmem:[%s4164_s4] sm:$0xff]  ;;  %v1232_v27 = vld [vmem:[%s4164_s4 + $0x8] sm:$0xff] }
 0xc91   :  { %964 = vrot.lane.b32.xlu1 %v956_v38, %s3498_s3  ;;  %v2730_v31 = vmul.f32 -1.442695, %v956_v38  ;;  %v1419_v38 = vld [vmem:[%s4165_s5] sm:$0xff] }
 0xc93   :  { %3348 = vpow2.f32 %v2730_v31 }
 0xc9d   :  { %v3349_v39 = vpop.eup %3348 }
 0xc9e   :  { %v960_v40 = vadd.f32 1.0, %v3349_v39  ;;  %v3183_v39 = vpack.c.bf16 %v1232_v27, %v1231_v37 }
 0xca0   :  { %3350 = vrcp.f32 %v960_v40  ;;  %v1420_v40 = vld [vmem:[%s4165_s5 + $0x8] sm:$0xff]  ;;  %3184 = vmatprep.subr.bf16.mxu1 %v3183_v39 }
 0xcaa   :  { %v3351_v55 = vpop.eup %3350 }
 0xcab   :  { %v969_v42 = vmul.f32 %v3351_v55, %v857_v28  ;;  %v978_v56 = vrot.slane %v3351_v55, 2 }
 0xd03   :  { %v965_v45 = vpop.permute.xlu1 %964 }
 0xd04   :  { %v966_v41 = vrot.slane %v965_v45, 2 }
 0xd06   :  { %3352 = vtanh.f32 %v966_v41  ;;  %v3199_v41 = vpack.c.bf16 %v1420_v40, %v1419_v38 }
 0xd08   :  { %3200 = vmatprep.subr.bf16.mxu0 %v3199_v41 }
 0xd10   :  { %v3353_v59 = vpop.eup %3352 }
 0xd11   :  { %v970_v63 = vmul.f32 %v3353_v59, %v3351_v55  ;;  %v1233_v59 = vld [vmem:[%s4164_s4 + $0x10] sm:$0xff] }
 0xd13   :  { %972 = vrot.lane.b32.xlu0 %v970_v63, %s3498_s3  ;;  %v1234_v63 = vld [vmem:[%s4164_s4 + $0x18] sm:$0xff] }
 0xd85   :  { %v973_v44 = vpop.permute.xlu0 %972 }
 0xd86   :  { %v975_v46 = vadd.f32 %v973_v44, %v969_v42  ;;  %v1421_v42 = vld [vmem:[%s4165_s5 + $0x10] sm:$0xff]  ;;  %v3187_v44 = vpack.c.bf16 %v1234_v63, %v1233_v59 }
 0xd88   :  { %3354 = vtanh.f32 %v975_v46 }
 0xd92   :  { %v3355_v47 = vpop.eup %3354 }
 0xd93   :  { %981 = vrot.lane.b32.xlu1 %v3355_v47, %s3498_s3  ;;  %v1235_v47 = vld [vmem:[%s4164_s4 + $0x20] sm:$0xff] }
 0xd94   :  { %v3191_v50 = vpack.c.bf16 %v1236_v48, %v1235_v47 }
 0xe05   :  { %v982_v57 = vpop.permute.xlu1 %981 }
 0xe06   :  { %v984_v60 = vmul.f32 %v982_v57, %v978_v56  ;;  %v1238_v56 = vld [vmem:[%s4164_s4 + $0x38] sm:$0xff]  ;;  %v1425_v57 = vld [vmem:[%s4165_s5 + $0x30] sm:$0xff] }
 0xe08   :  { %986 = vst.msk [vmem:[#allocation5 + $0xa] sm:$0x3] %vm395_vm1, %v984_v60  ;;  %2731 = vmatmul.mubr.msk.f32.vlgmr.msra.gmra.mrb[6].mxu1 %vm126_vm0, %v984_v60  ;;  %v3195_v60 = vpack.c.bf16 %v1238_v56, %v1237_v53 }
 0xe09   :  { %2872 = vmatprep.mubr.msk.f32.mxu1 %vm126_vm0, %v1270_v61  ;;  %3186 = vmatpush3.bf16.msra.mxu1 %v3183_v39 }
 0xe0a   :  { %3188 = vmatprep.subr.bf16.mxu1 %v3187_v44 }
 0xe0d   :  { %3190 = vmatpush3.bf16.msra.mxu1 %v3187_v44 }
 0xe0e   :  { %3192 = vmatprep.subr.bf16.mxu1 %v3191_v50 }
 0xe11   :  { %3194 = vmatpush3.bf16.msra.mxu1 %v3191_v50 }
 0xe12   :  { %3196 = vmatprep.subr.bf16.mxu1 %v3195_v60 }
 0xe15   :  { %3198 = vmatpush3.bf16.msra.mxu1 %v3195_v60 }
 0xedb   :  { %v1058_v62 = vpop.f32.mrb[6].mxu1 }
 0xedc   :  { %v1060_v0 = vpop.f32.mrb[7].mxu1 }
 0xedd   :  { %v1065_v1 = vcombine.low %v1058_v62, %v1060_v0  ;;  %v3499_v0 = vmov 0.0|0.0  }
 0xede   :  { %3215 = vmatprep.subr.bf16.mxu1 %v3499_v0 }
 0xedf   :  { %v1072_v20 = vrot.slane %v1065_v1, %v3677_v43 }
 0xee1   :  { %v1074_v3 = vadd.f32 %v1072_v20, %v988_v2 }
 0xee3   :  { %1082 = vrot.lane.b32.xlu0 %v1074_v3, %s3498_s3  ;;  %v2732_v4 = vmul.f32 -1.442695, %v1074_v3  ;;  %v1228_v3 = vld [vmem:[#allocation5 + $0xa] sm:$0x3] }
 0xee5   :  { %3356 = vpow2.f32 %v2732_v4  ;;  %v1227_v4 = vld [vmem:[#allocation5 + $0x8] sm:$0x3] }
 0xeef   :  { %v3357_v5 = vpop.eup %3356 }
 0xef0   :  { %v1078_v6 = vadd.f32 1.0, %v3357_v5  ;;  %v1271_v5 = vcombine.low %v1227_v4, %v1228_v3 }
 0xef2   :  { %3358 = vrcp.f32 %v1078_v6 }
 0xefc   :  { %v3359_v10 = vpop.eup %3358 }
 0xefd   :  { %v1087_v13 = vmul.f32 %v3359_v10, %v975_v46  ;;  %v1096_v17 = vrot.slane %v3359_v10, 2  ;;  %v1422_v46 = vld [vmem:[%s4165_s5 + $0x18] sm:$0xff] }
 0xefe   :  { %v3203_v49 = vpack.c.bf16 %v1422_v46, %v1421_v42 }
 0xf55   :  { %v1083_v7 = vpop.permute.xlu0 %1082 }
 0xf56   :  { %v1084_v9 = vrot.slane %v1083_v7, 2 }
 0xf58   :  { %3360 = vtanh.f32 %v1084_v9 }
 0xf62   :  { %v3361_v11 = vpop.eup %3360 }
 0xf63   :  { %v1088_v12 = vmul.f32 %v3361_v11, %v3359_v10  ;;  %v1554_v10 = vld [vmem:[%s4166_s6] sm:$0xff]  ;;  %v1555_v11 = vld [vmem:[%s4166_s6 + $0x8] sm:$0xff] }
 0xf65   :  { %1090 = vrot.lane.b32.xlu1 %v1088_v12, %s3498_s3  ;;  %v1279_v12 = vrot.slane %v1271_v5, %v3677_v43 }
 0xfd7   :  { %v1091_v14 = vpop.permute.xlu1 %1090 }
 0xfd8   :  { %v1093_v15 = vadd.f32 %v1091_v14, %v1087_v13  ;;  %v3920_v14 = vpack.c.bf16 %v1555_v11, %v1554_v10 }
 0xfda   :  { %3362 = vtanh.f32 %v1093_v15 }
 0xfe4   :  { %v3363_v16 = vpop.eup %3362 }
 0xfe5   :  { %1099 = vrot.lane.b32.xlu0 %v3363_v16, %s3498_s3  ;;  %v1556_v16 = vld [vmem:[%s4166_s6 + $0x10] sm:$0xff] }
0x1057   :  { %v1100_v18 = vpop.permute.xlu0 %1099 }
0x1058   :  { %v1102_v19 = vmul.f32 %v1100_v18, %v1096_v17  ;;  %v1557_v17 = vld [vmem:[%s4166_s6 + $0x18] sm:$0xff] }
0x1059   :  { %v3931_v18 = vpack.c.bf16 %v1557_v17, %v1556_v16 }
0x105a   :  { %1104 = vst.msk [vmem:[#allocation5 + $0xc] sm:$0x3] %vm395_vm1, %v1102_v19  ;;  %2733 = vmatmul.mubr.msk.f32.vlgmr.msra.gmra.mrb[10].mxu0 %vm126_vm0, %v1102_v19  ;;  %v2735_v19 = vld [vmem:[%s4167_s7] ss:$0 sm:$0xff]  ;;  %s3501_s7 = smov 32  }
0x105b   :  { %2891 = vmatprep.mubr.msk.f32.mxu0 %vm126_vm0, %v1270_v61  ;;  %3202 = vmatpush3.bf16.msra.mxu0 %v3199_v41  ;;  %v3211_v61 = vpack.c.bf16 %v1426_v58, %v1425_v57 }
0x105c   :  { %3204 = vmatprep.subr.bf16.mxu0 %v3203_v49 }
0x105f   :  { %3206 = vmatpush3.bf16.msra.mxu0 %v3203_v49 }
0x1060   :  { %3208 = vmatprep.subr.bf16.mxu0 %v3207_v54 }
0x1061   :  { %v1229_v6 = vld [vmem:[#allocation5 + $0xc] sm:$0x3] }
0x1063   :  { %3210 = vmatpush3.bf16.msra.mxu0 %v3207_v54 }
0x1064   :  { %3212 = vmatprep.subr.bf16.mxu0 %v3211_v61 }
0x1067   :  { %3214 = vmatpush3.bf16.msra.mxu0 %v3211_v61 }
0x1068   :  { %3239 = vmatprep.subr.bf16.mxu0 %v3499_v0 }
0x112d   :  { %v1176_v21 = vpop.f32.mrb[10].mxu0 }
0x112e   :  { %v1178_v22 = vpop.f32.mrb[11].mxu0 }
0x112f   :  { %v1183_v23 = vcombine.low %v1176_v21, %v1178_v22 }
0x1131   :  { %v1190_v24 = vrot.slane %v1183_v23, %v3677_v43 }
0x1133   :  { %v1192_v26 = vadd.f32 %v1190_v24, %v1106_v25 }
0x1135   :  { %1200 = vrot.lane.b32.xlu1 %v1192_v26, %s3498_s3  ;;  %v2734_v28 = vmul.f32 -1.442695, %v1192_v26 }
0x1137   :  { %3364 = vpow2.f32 %v2734_v28 }
0x1141   :  { %v3365_v29 = vpop.eup %3364 }
0x1142   :  { %v1196_v30 = vadd.f32 1.0, %v3365_v29 }
0x1144   :  { %3366 = vrcp.f32 %v1196_v30 }
0x114e   :  { %v3367_v34 = vpop.eup %3366 }
0x114f   :  { %v1205_v31 = vmul.f32 %v3367_v34, %v1093_v15  ;;  %v1214_v1 = vrot.slane %v3367_v34, 2 }
0x11a7   :  { %v1201_v32 = vpop.permute.xlu1 %1200 }
0x11a8   :  { %v1202_v33 = vrot.slane %v1201_v32, 2 }
0x11aa   :  { %3368 = vtanh.f32 %v1202_v33 }
0x11b4   :  { %v3369_v35 = vpop.eup %3368 }
0x11b5   :  { %v1206_v36 = vmul.f32 %v3369_v35, %v3367_v34 }
0x11b7   :  { %1208 = vrot.lane.b32.xlu0 %v1206_v36, %s3498_s3 }
0x1229   :  { %v1209_v45 = vpop.permute.xlu0 %1208 }
0x122a   :  { %v1211_v55 = vadd.f32 %v1209_v45, %v1205_v31 }
0x122c   :  { %3370 = vtanh.f32 %v1211_v55 }
0x1236   :  { %v3371_v62 = vpop.eup %3370 }
0x1237   :  { %1217 = vrot.lane.b32.xlu1 %v3371_v62, %s3498_s3 }
0x12a9   :  { %v1218_v20 = vpop.permute.xlu1 %1217 }
0x12aa   :  { %v1220_v2 = vmul.f32 %v1218_v20, %v1214_v1 }
0x12ac   :  { %1222 = vst.msk [vmem:[#allocation5 + $0xe] sm:$0x3] %vm395_vm1, %v1220_v2 }
0x12b3   :  { %v1230_v7 = vld [vmem:[#allocation5 + $0xe] sm:$0x3] }
0x12b4   :  { %v1272_v9 = vcombine.low %v1229_v6, %v1230_v7 }
0x12b6   :  { %v1286_v13 = vrot.slane %v1272_v9, %v3677_v43 }
0x12b8   :  { %v1287_v15 = vcombine.low %v1279_v12, %v1286_v13 }
0x12ba   :  { %2873 = vmatmul.mubr.msk.f32.vlgmr.msra.gmra.mrb[8].mxu1 %vm126_vm0, %v1287_v15  ;;  %2892 = vmatmul.mubr.msk.f32.vlgmr.msra.gmra.mrb[12].mxu0 %vm126_vm0, %v1287_v15 }
0x12bb   :  { %3217 = vmatpush3.bf16.msra.mxu1 %v3920_v14  ;;  %2902 = vmatprep.mubr.msk.f32.mxu1 %vm3500_vm2, %v3496_v8 }
0x12bc   :  { %3218 = vmatprep.subr.bf16.mxu1 %v3499_v0  ;;  %3241 = vmatpush3.bf16.msra.mxu0 %v3920_v14 }
0x12bd   :  { %3242 = vmatprep.subr.bf16.mxu0 %v3499_v0  ;;  %2946 = vmatprep.mubr.msk.f32.mxu0 %vm3500_vm2, %v3496_v8 }
0x12bf   :  { %3220 = vmatpush3.bf16.msra.mxu1 %v3931_v18 }
0x12c0   :  { %3221 = vmatprep.subr.bf16.mxu1 %v3499_v0  ;;  %3244 = vmatpush3.bf16.msra.mxu0 %v3931_v18 }
0x12c1   :  { %3251 = vmatprep.subr.bf16.mxu0 %v3499_v0 }
0x12c2   :  { %2903 = vmatmul.mubr.f32.vlgmr.msra.gmra.mrb[10].mxu1 %v3496_v8 }
0x12c3   :  { %3223 = vmatpush3.bf16.msra.mxu1 %v3920_v14  ;;  %2913 = vmatprep.mubr.msk.f32.mxu1 %vm3500_vm2, %v3496_v8 }
0x12c4   :  { %3224 = vmatprep.subr.bf16.mxu1 %v3499_v0 }
0x12c7   :  { %3226 = vmatpush3.bf16.msra.mxu1 %v3931_v18 }
0x12c8   :  { %3227 = vmatprep.subr.bf16.mxu1 %v3499_v0 }
0x138d   :  { %v2874_v21 = vpop.f32.mrb[8].mxu1  ;;  %v2893_v22 = vpop.f32.mrb[12].mxu0 }
0x138e   :  { %v1364_v23 = vadd.f32 %v2874_v21, %v2735_v19  ;;  %v1521_v24 = vcombine.high %v2893_v22, %v2893_v22  ;;  %v1528_v25 = vrot.slane %v2893_v22, %v3677_v43  ;;  %2746 = vst.sshfl [vmem:[#allocation4 + $0x8] sm:$0x3 pattern:$0x76325410] %v2893_v22  ;;  %v1358_v26 = vpop.f32.mrb[9].mxu1  ;;  %v1493_v28 = vpop.f32.mrb[13].mxu0 }
0x138f   :  { %v1359_v29 = vadd.f32 %v2735_v19, %v1358_v26  ;;  %v1504_v30 = vcombine.high %v1493_v28, %v1493_v28  ;;  %v1511_v32 = vrot.slane %v1493_v28, %v3677_v43  ;;  %2744 = vst.sshfl [vmem:[#allocation4] sm:$0x3 pattern:$0x76325410] %v1493_v28 }
0x1390   :  { %v1386_v33 = vcombine.high %v1364_v23, %v1364_v23  ;;  %v1393_v34 = vrot.slane %v1364_v23, %v3677_v43  ;;  %2740 = vst.sshfl [vmem:[#allocation3 + $0x8] sm:$0x3 pattern:$0x76325410] %v1364_v23  ;;  %v1535_v35 = vrot.slane %v1521_v24, %v3677_v43  ;;  %v1536_v36 = vcombine.high %v1528_v25, %v1528_v25 }
0x1391   :  { %2747 = vst.sshfl [vmem:[#allocation4 + $0xc] sm:$0x3 pattern:$0x76325410] %v1521_v24  ;;  %v1369_v37 = vcombine.high %v1359_v29, %v1359_v29  ;;  %v1376_v27 = vrot.slane %v1359_v29, %v3677_v43  ;;  %v1518_v38 = vrot.slane %v1504_v30, %v3677_v43  ;;  %v1519_v31 = vcombine.high %v1511_v32, %v1511_v32 }
0x1392   :  { %2738 = vst.sshfl [vmem:[#allocation3] sm:$0x3 pattern:$0x76325410] %v1359_v29  ;;  %v1400_v39 = vrot.slane %v1386_v33, %v3677_v43  ;;  %v1401_v40 = vcombine.high %v1393_v34, %v1393_v34  ;;  %v1537_v45 = vcombine.high %v1535_v35, %v1535_v35  ;;  %1551 = vst [vmem:[#allocation4 + $0xa] sm:$0x3] %v1536_v36 }
0x1393   :  { %2745 = vst.sshfl [vmem:[#allocation4 + $0x4] sm:$0x3 pattern:$0x76325410] %v1504_v30  ;;  %v1383_v41 = vrot.slane %v1369_v37, %v3677_v43  ;;  %v1384_v55 = vcombine.high %v1376_v27, %v1376_v27  ;;  %v1520_v59 = vcombine.high %v1518_v38, %v1518_v38  ;;  %1547 = vst [vmem:[#allocation4 + $0x2] sm:$0x3] %v1519_v31 }
0x1394   :  { %2741 = vst.sshfl [vmem:[#allocation3 + $0xc] sm:$0x3 pattern:$0x76325410] %v1386_v33  ;;  %v1402_v63 = vcombine.high %v1400_v39, %v1400_v39  ;;  %1416 = vst [vmem:[#allocation3 + $0xa] sm:$0x3] %v1401_v40 }
0x1395   :  { %2739 = vst.sshfl [vmem:[#allocation3 + $0x4] sm:$0x3 pattern:$0x76325410] %v1369_v37  ;;  %1553 = vst [vmem:[#allocation4 + $0xe] sm:$0x3] %v1537_v45  ;;  %v1385_v42 = vcombine.high %v1383_v41, %v1383_v41 }
0x1396   :  { %1412 = vst [vmem:[#allocation3 + $0x2] sm:$0x3] %v1384_v55  ;;  %1549 = vst [vmem:[#allocation4 + $0x6] sm:$0x3] %v1520_v59  ;;  %v1631_v44 = vpop.f32.mrb[10].mxu1 }
0x1397   :  { %1418 = vst [vmem:[#allocation3 + $0xe] sm:$0x3] %v1402_v63  ;;  %v2904_v46 = vpop.f32.mrb[11].mxu1  ;;  %1414 = vst [vmem:[#allocation3 + $0x6] sm:$0x3] %v1385_v42 }
0x1398   :  { %v1663_v4 = vld [vmem:[#allocation4 + $0xc] sm:$0x3]  ;;  %v1873_v46 = vld [vmem:[#allocation4 + $0x8] sm:$0x3] }
0x1399   :  { %v1558_v47 = vld [vmem:[#allocation3] sm:$0x3]  ;;  %v1768_v29 = vld [vmem:[#allocation4 + $0xa] sm:$0x3] }
0x139c   :  { %v1560_v48 = vld [vmem:[#allocation4 + $0xe] sm:$0x3]  ;;  %v1766_v28 = vld [vmem:[#allocation3 + $0x4] sm:$0x3] }
0x139d   :  { %v1561_v49 = vadd.f32 %v1560_v48, %v1558_v47  ;;  %v1661_v3 = vld [vmem:[#allocation3 + $0x2] sm:$0x3]  ;;  %v1769_v30 = vadd.f32 %v1768_v29, %v1766_v28  ;;  %v2081_v28 = vld [vmem:[#allocation3 + $0xa] sm:$0x3]  ;;  %v2083_v29 = vld [vmem:[#allocation4 + $0x4] sm:$0x3] }
0x139e   :  { %v1664_v5 = vadd.f32 %v1663_v4, %v1661_v3  ;;  %v1978_v3 = vld [vmem:[#allocation4 + $0x6] sm:$0x3]  ;;  %v1976_v4 = vld [vmem:[#allocation3 + $0x8] sm:$0x3] }
0x139f   :  { %v1635_v50 = vadd.f32 %v1631_v44, %v1561_v49  ;;  %v1871_v44 = vld [vmem:[#allocation3 + $0x6] sm:$0x3] }
0x13a0   :  { %v1874_v47 = vadd.f32 %v1873_v46, %v1871_v44  ;;  %v2406_v44 = vld [vmem:[%s4169_s9 + $0x10] sm:$0xff]  ;;  %v2407_v46 = vld [vmem:[%s4169_s9 + $0x18] sm:$0xff] }
0x13a1   :  { %3372 = vtanh.f32 %v1635_v50  ;;  %v2748_v51 = vmul.f32 -1.442695, %v1635_v50 }
0x13a3   :  { %3374 = vpow2.f32 %v2748_v51 }
0x13ab   :  { %v3373_v43 = vpop.eup %3372 }
0x13ac   :  { %1645 = vrot.lane.b32.xlu0 %v3373_v43, %s3501_s7 }
0x13ad   :  { %v3375_v52 = vpop.eup %3374 }
0x13ae   :  { %v1639_v53 = vadd.f32 1.0, %v3375_v52 }
0x13b0   :  { %3376 = vrcp.f32 %v1639_v53 }
0x13ba   :  { %v3377_v54 = vpop.eup %3376 }
0x13bb   :  { %v1643_v58 = vmul.f32 0.0, %v3377_v54 }
0x141e   :  { %v1646_v56 = vpop.permute.xlu0 %1645 }
0x141f   :  { %v1648_v57 = vmul.f32 %v3377_v54, %v1646_v56 }
0x1421   :  { %1650 = vrot.lane.b32.xlu1 %v1648_v57, %s3501_s7 }
0x1493   :  { %v1651_v60 = vpop.permute.xlu1 %1650 }
0x1494   :  { %v1653_v61 = vadd.f32 %v1651_v60, %v1643_v58 }
0x1496   :  { %3378 = vtanh.f32 %v1653_v61 }
0x14a0   :  { %v3379_v62 = vpop.eup %3378 }
0x14a1   :  { %1656 = vrot.lane.b32.xlu0 %v3379_v62, %s3501_s7 }
0x1513   :  { %v1657_v1 = vpop.permute.xlu0 %1656 }
0x1514   :  { %v1659_v20 = vmul.f32 %v3377_v54, %v1657_v1 }
0x1516   :  { %1666 = vrot.lane.b32.xlu1 %v1659_v20, %s3498_s3 }
0x1588   :  { %v1667_v2 = vpop.permute.xlu1 %1666 }
0x1589   :  { %2914 = vmatmul.mubr.msk.f32.vlgmr.msra.gmra.mrb[12].mxu1 %vm1562_vm3, %v1667_v2 }
0x158a   :  { %3229 = vmatpush3.bf16.msra.mxu1 %v3920_v14  ;;  %2924 = vmatprep.mubr.msk.f32.mxu1 %vm3500_vm2, %v3496_v8 }
0x158b   :  { %3230 = vmatprep.subr.bf16.mxu1 %v3499_v0 }
0x158e   :  { %3232 = vmatpush3.bf16.msra.mxu1 %v3931_v18 }
0x158f   :  { %3233 = vmatprep.subr.bf16.mxu1 %v3499_v0 }
0x165c   :  { %v1736_v6 = vpop.f32.mrb[12].mxu1 }
0x165d   :  { %v1740_v7 = vadd.f32 %v1736_v6, %v1664_v5  ;;  %v2915_v9 = vpop.f32.mrb[13].mxu1  ;;  %v1979_v5 = vadd.f32 %v1978_v3, %v1976_v4 }
0x165f   :  { %3380 = vtanh.f32 %v1740_v7  ;;  %v2750_v11 = vmul.f32 -1.442695, %v1740_v7 }
0x1661   :  { %3382 = vpow2.f32 %v2750_v11 }
0x1669   :  { %v3381_v10 = vpop.eup %3380 }
0x166a   :  { %1750 = vrot.lane.b32.xlu0 %v3381_v10, %s3501_s7 }
0x166b   :  { %v3383_v12 = vpop.eup %3382 }
0x166c   :  { %v1744_v13 = vadd.f32 1.0, %v3383_v12 }
0x166e   :  { %3384 = vrcp.f32 %v1744_v13 }
0x1678   :  { %v3385_v15 = vpop.eup %3384 }
0x1679   :  { %v1748_v19 = vmul.f32 %v3385_v15, %v1653_v61 }
0x16dc   :  { %v1751_v16 = vpop.permute.xlu0 %1750 }
0x16dd   :  { %v1753_v17 = vmul.f32 %v3385_v15, %v1751_v16 }
0x16df   :  { %1755 = vrot.lane.b32.xlu1 %v1753_v17, %s3501_s7 }
0x1751   :  { %v1756_v21 = vpop.permute.xlu1 %1755 }
0x1752   :  { %v1758_v22 = vadd.f32 %v1756_v21, %v1748_v19 }
0x1754   :  { %3386 = vtanh.f32 %v1758_v22 }
0x175e   :  { %v3387_v23 = vpop.eup %3386 }
0x175f   :  { %1761 = vrot.lane.b32.xlu0 %v3387_v23, %s3501_s7 }
0x17d1   :  { %v1762_v24 = vpop.permute.xlu0 %1761 }
0x17d2   :  { %v1764_v25 = vmul.f32 %v3385_v15, %v1762_v24 }
0x17d4   :  { %1771 = vrot.lane.b32.xlu1 %v1764_v25, %s3498_s3 }
0x1846   :  { %v1772_v26 = vpop.permute.xlu1 %1771 }
0x1847   :  { %2925 = vmatmul.mubr.msk.f32.vlgmr.msra.gmra.mrb[14].mxu1 %vm1562_vm3, %v1772_v26 }
0x1848   :  { %3235 = vmatpush3.bf16.msra.mxu1 %v3920_v14  ;;  %2935 = vmatprep.mubr.msk.f32.mxu1 %vm3500_vm2, %v3496_v8 }
0x1849   :  { %3236 = vmatprep.subr.bf16.mxu1 %v3499_v0 }
0x184c   :  { %3238 = vmatpush3.bf16.msra.mxu1 %v3931_v18 }
0x184d   :  { %3245 = vmatprep.subr.bf16.mxu1 %v3499_v0 }
0x191a   :  { %v1841_v32 = vpop.f32.mrb[14].mxu1 }
0x191b   :  { %v1845_v33 = vadd.f32 %v1841_v32, %v1769_v30  ;;  %v2926_v34 = vpop.f32.mrb[15].mxu1  ;;  %v2084_v30 = vadd.f32 %v2083_v29, %v2081_v28  ;;  %v2400_v28 = vld [vmem:[%s4168_s8 + $0x28] sm:$0xff] }
0x191d   :  { %3388 = vtanh.f32 %v1845_v33  ;;  %v2752_v36 = vmul.f32 -1.442695, %v1845_v33 }
0x191f   :  { %3390 = vpow2.f32 %v2752_v36 }
0x1927   :  { %v3389_v35 = vpop.eup %3388 }
0x1928   :  { %1855 = vrot.lane.b32.xlu0 %v3389_v35, %s3501_s7 }
0x1929   :  { %v3391_v37 = vpop.eup %3390 }
0x192a   :  { %v1849_v27 = vadd.f32 1.0, %v3391_v37 }
0x192c   :  { %3392 = vrcp.f32 %v1849_v27 }
0x1936   :  { %v3393_v38 = vpop.eup %3392 }
0x1937   :  { %v1853_v40 = vmul.f32 %v3393_v38, %v1758_v22 }
0x199a   :  { %v1856_v31 = vpop.permute.xlu0 %1855 }
0x199b   :  { %v1858_v39 = vmul.f32 %v3393_v38, %v1856_v31 }
0x199d   :  { %1860 = vrot.lane.b32.xlu1 %v1858_v39, %s3501_s7 }
0x1a0f   :  { %v1861_v45 = vpop.permute.xlu1 %1860 }
0x1a10   :  { %v1863_v41 = vadd.f32 %v1861_v45, %v1853_v40 }
0x1a12   :  { %3394 = vtanh.f32 %v1863_v41 }
0x1a1c   :  { %v3395_v55 = vpop.eup %3394 }
0x1a1d   :  { %1866 = vrot.lane.b32.xlu0 %v3395_v55, %s3501_s7 }
0x1a8f   :  { %v1867_v59 = vpop.permute.xlu0 %1866 }
0x1a90   :  { %v1869_v63 = vmul.f32 %v3393_v38, %v1867_v59  ;;  %v2404_v59 = vld [vmem:[%s4169_s9] sm:$0xff] }
0x1a92   :  { %1876 = vrot.lane.b32.xlu1 %v1869_v63, %s3498_s3  ;;  %v2405_v63 = vld [vmem:[%s4169_s9 + $0x8] sm:$0xff] }
0x1b04   :  { %v1877_v42 = vpop.permute.xlu1 %1876 }
0x1b05   :  { %2936 = vmatmul.mubr.msk.f32.vlgmr.msra.gmra.mrb[16].mxu1 %vm1562_vm3, %v1877_v42  ;;  %v3264_v42 = vpack.c.bf16 %v2405_v63, %v2404_v59 }
0x1b06   :  { %3247 = vmatpush3.bf16.msra.mxu1 %v3920_v14  ;;  %2957 = vmatprep.mubr.msk.f32.mxu1 %vm3500_vm2, %v3496_v8 }
0x1b07   :  { %3248 = vmatprep.subr.bf16.mxu1 %v3499_v0 }
0x1b0a   :  { %3250 = vmatpush3.bf16.msra.mxu1 %v3931_v18 }
0x1b0b   :  { %3257 = vmatprep.subr.bf16.mxu1 %v3499_v0 }
0x1bd8   :  { %v1946_v48 = vpop.f32.mrb[16].mxu1 }
0x1bd9   :  { %v1950_v49 = vadd.f32 %v1946_v48, %v1874_v47  ;;  %v2937_v50 = vpop.f32.mrb[17].mxu1  ;;  %v3267_v48 = vpack.c.bf16 %v2407_v46, %v2406_v44 }
0x1bda   :  { %v2409_v50 = vld [vmem:[%s4169_s9 + $0x28] sm:$0xff] }
0x1bdb   :  { %3396 = vtanh.f32 %v1950_v49  ;;  %v2754_v51 = vmul.f32 -1.442695, %v1950_v49  ;;  %v2408_v49 = vld [vmem:[%s4169_s9 + $0x20] sm:$0xff] }
0x1bdd   :  { %3398 = vpow2.f32 %v2754_v51  ;;  %v2410_v51 = vld [vmem:[%s4169_s9 + $0x30] sm:$0xff] }
0x1be5   :  { %v3397_v43 = vpop.eup %3396 }
0x1be6   :  { %1960 = vrot.lane.b32.xlu0 %v3397_v43, %s3501_s7  ;;  %v3270_v43 = vpack.c.bf16 %v2409_v50, %v2408_v49 }
0x1be7   :  { %v3399_v52 = vpop.eup %3398 }
0x1be8   :  { %v1954_v53 = vadd.f32 1.0, %v3399_v52  ;;  %v2411_v52 = vld [vmem:[%s4169_s9 + $0x38] sm:$0xff] }
0x1bea   :  { %3400 = vrcp.f32 %v1954_v53  ;;  %v3273_v53 = vpack.c.bf16 %v2411_v52, %v2410_v51 }
0x1bf4   :  { %v3401_v54 = vpop.eup %3400 }
0x1bf5   :  { %v1958_v58 = vmul.f32 %v3401_v54, %v1863_v41 }
0x1c58   :  { %v1961_v56 = vpop.permute.xlu0 %1960 }
0x1c59   :  { %v1963_v57 = vmul.f32 %v3401_v54, %v1961_v56  ;;  %v2186_v56 = vld [vmem:[#allocation3 + $0xc] sm:$0x3] }
0x1c5b   :  { %1965 = vrot.lane.b32.xlu1 %v1963_v57, %s3501_s7  ;;  %v2188_v57 = vld [vmem:[#allocation4 + $0x2] sm:$0x3] }
0x1ccd   :  { %v1966_v60 = vpop.permute.xlu1 %1965 }
0x1cce   :  { %v1968_v61 = vadd.f32 %v1966_v60, %v1958_v58  ;;  %v2189_v58 = vadd.f32 %v2188_v57, %v2186_v56 }
0x1cd0   :  { %3402 = vtanh.f32 %v1968_v61 }
0x1cda   :  { %v3403_v62 = vpop.eup %3402 }
0x1cdb   :  { %1971 = vrot.lane.b32.xlu0 %v3403_v62, %s3501_s7 }
0x1d4d   :  { %v1972_v1 = vpop.permute.xlu0 %1971 }
0x1d4e   :  { %v1974_v20 = vmul.f32 %v3401_v54, %v1972_v1  ;;  %v2403_v54 = vld [vmem:[#allocation5] sm:$0x3] }
0x1d50   :  { %1981 = vrot.lane.b32.xlu1 %v1974_v20, %s3498_s3 }
0x1dc2   :  { %v1982_v2 = vpop.permute.xlu1 %1981 }
0x1dc3   :  { %2947 = vmatmul.mubr.msk.f32.vlgmr.msra.gmra.mrb[14].mxu0 %vm1562_vm3, %v1982_v2 }
0x1dc4   :  { %3253 = vmatpush3.bf16.msra.mxu0 %v3920_v14  ;;  %2968 = vmatprep.mubr.msk.f32.mxu0 %vm3500_vm2, %v3496_v8 }
0x1dc5   :  { %3254 = vmatprep.subr.bf16.mxu0 %v3499_v0 }
0x1dc8   :  { %3256 = vmatpush3.bf16.msra.mxu0 %v3931_v18 }
0x1dc9   :  { %3263 = vmatprep.subr.bf16.mxu0 %v3499_v0 }
0x1e96   :  { %v2051_v6 = vpop.f32.mrb[14].mxu0 }
0x1e97   :  { %v2055_v7 = vadd.f32 %v2051_v6, %v1979_v5  ;;  %v2948_v9 = vpop.f32.mrb[15].mxu0 }
0x1e99   :  { %3404 = vtanh.f32 %v2055_v7  ;;  %v2756_v11 = vmul.f32 -1.442695, %v2055_v7 }
0x1e9b   :  { %3406 = vpow2.f32 %v2756_v11 }
0x1ea3   :  { %v3405_v10 = vpop.eup %3404 }
0x1ea4   :  { %2065 = vrot.lane.b32.xlu0 %v3405_v10, %s3501_s7 }
0x1ea5   :  { %v3407_v12 = vpop.eup %3406 }
0x1ea6   :  { %v2059_v13 = vadd.f32 1.0, %v3407_v12 }
0x1ea8   :  { %3408 = vrcp.f32 %v2059_v13 }
0x1eb2   :  { %v3409_v15 = vpop.eup %3408 }
0x1eb3   :  { %v2063_v19 = vmul.f32 %v3409_v15, %v1968_v61 }
0x1f16   :  { %v2066_v16 = vpop.permute.xlu0 %2065 }
0x1f17   :  { %v2068_v17 = vmul.f32 %v3409_v15, %v2066_v16 }
0x1f19   :  { %2070 = vrot.lane.b32.xlu1 %v2068_v17, %s3501_s7  ;;  %v2395_v17 = vld [vmem:[%s4168_s8] sm:$0xff] }
0x1f8b   :  { %v2071_v21 = vpop.permute.xlu1 %2070 }
0x1f8c   :  { %v2073_v22 = vadd.f32 %v2071_v21, %v2063_v19  ;;  %v2396_v19 = vld [vmem:[%s4168_s8 + $0x8] sm:$0xff] }
0x1f8d   :  { %v3276_v21 = vpack.c.bf16 %v2396_v19, %v2395_v17 }
0x1f8e   :  { %3410 = vtanh.f32 %v2073_v22 }
0x1f98   :  { %v3411_v23 = vpop.eup %3410 }
0x1f99   :  { %2076 = vrot.lane.b32.xlu0 %v3411_v23, %s3501_s7  ;;  %v2398_v23 = vld [vmem:[%s4168_s8 + $0x18] sm:$0xff] }
0x200b   :  { %v2077_v24 = vpop.permute.xlu0 %2076 }
0x200c   :  { %v2079_v25 = vmul.f32 %v3409_v15, %v2077_v24 }
0x200e   :  { %2086 = vrot.lane.b32.xlu1 %v2079_v25, %s3498_s3 }
0x2080   :  { %v2087_v26 = vpop.permute.xlu1 %2086 }
0x2081   :  { %2958 = vmatmul.mubr.msk.f32.vlgmr.msra.gmra.mrb[18].mxu1 %vm1562_vm3, %v2087_v26  ;;  %v2399_v26 = vld [vmem:[%s4168_s8 + $0x20] sm:$0xff] }
0x2082   :  { %3259 = vmatpush3.bf16.msra.mxu1 %v3920_v14  ;;  %2979 = vmatprep.mubr.msk.f32.mxu1 %vm3500_vm2, %v3496_v8  ;;  %v3282_v29 = vpack.c.bf16 %v2400_v28, %v2399_v26 }
0x2083   :  { %3260 = vmatprep.subr.bf16.mxu1 %v3499_v0 }
0x2086   :  { %3262 = vmatpush3.bf16.msra.mxu1 %v3931_v18 }
0x2087   :  { %3275 = vmatprep.subr.bf16.mxu1 %v3499_v0 }
0x2154   :  { %v2156_v32 = vpop.f32.mrb[18].mxu1 }
0x2155   :  { %v2160_v33 = vadd.f32 %v2156_v32, %v2084_v30  ;;  %v2959_v34 = vpop.f32.mrb[19].mxu1  ;;  %v2401_v30 = vld [vmem:[%s4168_s8 + $0x30] sm:$0xff] }
0x2156   :  { %v2291_v34 = vld [vmem:[#allocation3 + $0xe] sm:$0x3] }
0x2157   :  { %3412 = vtanh.f32 %v2160_v33  ;;  %v2758_v14 = vmul.f32 -1.442695, %v2160_v33  ;;  %v2394_v33 = vld [vmem:[#allocation5 + $0xe] sm:$0x3] }
0x2159   :  { %3414 = vpow2.f32 %v2758_v14 }
0x2161   :  { %v3413_v35 = vpop.eup %3412 }
0x2162   :  { %2170 = vrot.lane.b32.xlu0 %v3413_v35, %s3501_s7  ;;  %v2292_v35 = vld [vmem:[#allocation4] sm:$0x3] }
0x2163   :  { %v3415_v36 = vpop.eup %3414  ;;  %v2293_v14 = vadd.f32 %v2292_v35, %v2291_v34 }
0x2164   :  { %v2164_v37 = vadd.f32 1.0, %v3415_v36 }
0x2166   :  { %3416 = vrcp.f32 %v2164_v37 }
0x2170   :  { %v3417_v27 = vpop.eup %3416 }
0x2171   :  { %v2168_v31 = vmul.f32 %v3417_v27, %v2073_v22  ;;  %v2397_v22 = vld [vmem:[%s4168_s8 + $0x10] sm:$0xff] }
0x2172   :  { %v3279_v25 = vpack.c.bf16 %v2398_v23, %v2397_v22 }
0x21d4   :  { %v2171_v38 = vpop.permute.xlu0 %2170 }
0x21d5   :  { %v2173_v18 = vmul.f32 %v3417_v27, %v2171_v38 }
0x21d7   :  { %2175 = vrot.lane.b32.xlu1 %v2173_v18, %s3501_s7 }
0x2249   :  { %v2176_v39 = vpop.permute.xlu1 %2175 }
0x224a   :  { %v2178_v40 = vadd.f32 %v2176_v39, %v2168_v31  ;;  %v2765_v31 = vld [vmem:[%s4170_s10] ss:$0 sm:$0xff] }
0x224c   :  { %3418 = vtanh.f32 %v2178_v40 }
0x2256   :  { %v3419_v45 = vpop.eup %3418 }
0x2257   :  { %2181 = vrot.lane.b32.xlu0 %v3419_v45, %s3501_s7 }
0x22c9   :  { %v2182_v41 = vpop.permute.xlu0 %2181 }
0x22ca   :  { %v2184_v55 = vmul.f32 %v3417_v27, %v2182_v41 }
0x22cc   :  { %2191 = vrot.lane.b32.xlu1 %v2184_v55, %s3498_s3 }
0x233e   :  { %v2192_v47 = vpop.permute.xlu1 %2191 }
0x233f   :  { %2969 = vmatmul.mubr.msk.f32.vlgmr.msra.gmra.mrb[16].mxu0 %vm1562_vm3, %v2192_v47 }
0x2340   :  { %3265 = vmatpush3.bf16.msra.mxu0 %v3264_v42  ;;  %2998 = vmatprep.mubr.msk.f32.mxu0 %vm3500_vm2, %v3496_v8 }
0x2341   :  { %3266 = vmatprep.subr.bf16.mxu0 %v3499_v0 }
0x2344   :  { %3268 = vmatpush3.bf16.msra.mxu0 %v3267_v48 }
0x2345   :  { %3269 = vmatprep.subr.bf16.mxu0 %v3499_v0 }
0x2348   :  { %3271 = vmatpush3.bf16.msra.mxu0 %v3270_v43 }
0x2349   :  { %3272 = vmatprep.subr.bf16.mxu0 %v3499_v0 }
0x234c   :  { %3274 = vmatpush3.bf16.msra.mxu0 %v3273_v53 }
0x234d   :  { %3287 = vmatprep.subr.bf16.mxu0 %v3499_v0 }
0x234f   :  { %2999 = vmatmul.mubr.msk.f32.vlgmr.msra.gmra.mrb[18].mxu0 %vm126_vm0, %v2403_v54 }
0x2350   :  { %3036 = vmatprep.mubr.msk.f32.mxu0 %vm3500_vm2, %v3496_v8 }
0x2412   :  { %v2261_v60 = vpop.f32.mrb[16].mxu0 }
0x2413   :  { %v2265_v61 = vadd.f32 %v2261_v60, %v2189_v58  ;;  %v2970_v62 = vpop.f32.mrb[17].mxu0  ;;  %v2596_v60 = vld [vmem:[%s4171_s11] sm:$0xff] }
0x2414   :  { %v2598_v62 = vld [vmem:[%s4171_s11 + $0x10] sm:$0xff] }
0x2415   :  { %3420 = vtanh.f32 %v2265_v61  ;;  %v2760_v3 = vmul.f32 -1.442695, %v2265_v61  ;;  %v2597_v61 = vld [vmem:[%s4171_s11 + $0x8] sm:$0xff] }
0x2417   :  { %3422 = vpow2.f32 %v2760_v3 }
0x241f   :  { %v3421_v1 = vpop.eup %3420 }
0x2420   :  { %2275 = vrot.lane.b32.xlu0 %v3421_v1, %s3501_s7 }
0x2421   :  { %v3423_v4 = vpop.eup %3422 }
0x2422   :  { %v2481_v20 = vpop.f32.mrb[18].mxu0  ;;  %v2269_v5 = vadd.f32 1.0, %v3423_v4  ;;  %v2600_v4 = vld [vmem:[%s4171_s11 + $0x20] sm:$0xff] }
0x2423   :  { %v3000_v2 = vpop.f32.mrb[19].mxu0 }
0x2424   :  { %3424 = vrcp.f32 %v2269_v5  ;;  %v2599_v2 = vld [vmem:[%s4171_s11 + $0x18] sm:$0xff]  ;;  %v2601_v5 = vld [vmem:[%s4171_s11 + $0x28] sm:$0xff] }
0x2425   :  { %v3291_v3 = vpack.c.bf16 %v2599_v2, %v2598_v62 }
0x242e   :  { %v3425_v6 = vpop.eup %3424 }
0x242f   :  { %v2273_v10 = vmul.f32 %v3425_v6, %v2178_v40 }
0x2492   :  { %v2276_v7 = vpop.permute.xlu0 %2275 }
0x2493   :  { %v2278_v9 = vmul.f32 %v3425_v6, %v2276_v7  ;;  %v2602_v7 = vld [vmem:[%s4171_s11 + $0x30] sm:$0xff] }
0x2495   :  { %2280 = vrot.lane.b32.xlu1 %v2278_v9, %s3501_s7  ;;  %v2603_v9 = vld [vmem:[%s4171_s11 + $0x38] sm:$0xff]  ;;  %s3503_s11 = smov [#allocation8]  }
0x2496   :  { %s2702_s30 = sshll.u32 %s3503_s11, 4  ;;  %s2703_s30 = int_to_ptr.vmem [resolvable:$true] %s2702_s30 }
0x2497   :  { %s3448_s15 = scalar_lea.vmem %s2703_s30, 32  ;;  %p3453_p1 = scmp.lt.s32.totalorder %s2703_s30, %s2703_s30 }
0x2498   :  { %p3449_p0 = scmp.ne.s32.totalorder %s2703_s30, %s3448_s15  ;;  %p3454_p2 = scmp.lt.s32.totalorder %s3448_s15, %s3448_s15 }
0x249a   :  { %p3455_p3 = por %p3454_p2, %p3453_p1 }
0x249c   :  { %p3456_p4 = pnand %p3455_p3, %p3449_p0 }
0x2507   :  { %v2281_v11 = vpop.permute.xlu1 %2280 }
0x2508   :  { %v4057_v12 = vadd.f32 %v2281_v11, %v2273_v10  ;;  %v3297_v10 = vpack.c.bf16 %v2603_v9, %v2602_v7 }
0x250a   :  { %3426 = vtanh.f32 %v4057_v12 }
0x2514   :  { %v3427_v13 = vpop.eup %3426 }
0x2515   :  { %2286 = vrot.lane.b32.xlu0 %v3427_v13, %s3501_s7 }
0x2587   :  { %v2287_v15 = vpop.permute.xlu0 %2286 }
0x2588   :  { %v2289_v16 = vmul.f32 %v3425_v6, %v2287_v15  ;;  %v3294_v6 = vpack.c.bf16 %v2601_v5, %v2600_v4 }
0x258a   :  { %2295 = vrot.lane.b32.xlu1 %v2289_v16, %s3498_s3 }
0x25fc   :  { %v2296_v24 = vpop.permute.xlu1 %2295 }
0x25fd   :  { %2980 = vmatmul.mubr.msk.f32.vlgmr.msra.gmra.mrb[20].mxu1 %vm1562_vm3, %v2296_v24 }
0x25fe   :  { %3277 = vmatpush3.bf16.msra.mxu1 %v3276_v21  ;;  %3017 = vmatprep.mubr.msk.f32.mxu1 %vm3500_vm2, %v3496_v8  ;;  %v2402_v8 = vld [vmem:[%s4168_s8 + $0x38] sm:$0xff] }
0x25ff   :  { %3278 = vmatprep.subr.bf16.mxu1 %v3499_v0  ;;  %v3285_v32 = vpack.c.bf16 %v2402_v8, %v2401_v30 }
0x2602   :  { %3280 = vmatpush3.bf16.msra.mxu1 %v3279_v25 }
0x2603   :  { %3281 = vmatprep.subr.bf16.mxu1 %v3499_v0 }
0x2606   :  { %3283 = vmatpush3.bf16.msra.mxu1 %v3282_v29 }
0x2607   :  { %3284 = vmatprep.subr.bf16.mxu1 %v3499_v0 }
0x260a   :  { %3286 = vmatpush3.bf16.msra.mxu1 %v3285_v32 }
0x260d   :  { %3018 = vmatmul.mubr.msk.f32.vlgmr.msra.gmra.mrb[22].mxu1 %vm126_vm0, %v2394_v33 }
0x26d0   :  { %v2365_v36 = vpop.f32.mrb[20].mxu1 }
0x26d1   :  { %v2369_v37 = vadd.f32 %v2365_v36, %v2293_v14  ;;  %v2981_v27 = vpop.f32.mrb[21].mxu1 }
0x26d3   :  { %3428 = vtanh.f32 %v2369_v37  ;;  %v2762_v55 = vmul.f32 -1.442695, %v2369_v37 }
0x26dd   :  { %v3429_v38 = vpop.eup %3428 }
0x26de   :  { %2379 = vrot.lane.b32.xlu0 %v3429_v38, %s3501_s7 }
0x26e0   :  { %v2554_v18 = vpop.f32.mrb[22].mxu1 }
0x26e1   :  { %v2555_v39 = vadd.f32 %v2554_v18, %v2481_v20  ;;  %v3019_v40 = vpop.f32.mrb[23].mxu1  ;;  %v3288_v20 = vpack.c.bf16 %v2597_v61, %v2596_v60 }
0x26e3   :  { %v2565_v45 = vadd.f32 %v2765_v31, %v2555_v39  ;;  %3289 = vmatpush3.bf16.msra.mxu0 %v3288_v20 }
0x26e4   :  { %3290 = vmatprep.subr.bf16.mxu0 %v3499_v0 }
0x26e5   :  { %3430 = vtanh.f32 %v2565_v45  ;;  %v2766_v42 = vmul.f32 -1.442695, %v2565_v45 }
0x26e6   :  { %3432 = vpow2.f32 %v2762_v55 }
0x26e7   :  { %3292 = vmatpush3.bf16.msra.mxu0 %v3291_v3 }
0x26e8   :  { %3293 = vmatprep.subr.bf16.mxu0 %v3499_v0 }
0x26eb   :  { %3295 = vmatpush3.bf16.msra.mxu0 %v3294_v6 }
0x26ec   :  { %3296 = vmatprep.subr.bf16.mxu0 %v3499_v0 }
0x26ef   :  { %v3431_v41 = vpop.eup %3430  ;;  %3298 = vmatpush3.bf16.msra.mxu0 %v3297_v10 }
0x26f0   :  { %2574 = vrot.lane.b32.xlu0 %v3431_v41, %s3501_s7  ;;  %v3433_v59 = vpop.eup %3432 }
0x26f1   :  { %v2373_v63 = vadd.f32 1.0, %v3433_v59 }
0x26f3   :  { %3434 = vrcp.f32 %v2373_v63 }
0x26f4   :  { %3436 = vpow2.f32 %v2766_v42 }
0x26fd   :  { %v3435_v44 = vpop.eup %3434 }
0x26fe   :  { %v3437_v47 = vpop.eup %3436  ;;  %v2377_v53 = vmul.f32 %v3435_v44, %v4057_v12 }
0x26ff   :  { %v2569_v49 = vadd.f32 1.0, %v3437_v47 }
0x2701   :  { %3438 = vrcp.f32 %v2569_v49 }
0x270b   :  { %v3439_v50 = vpop.eup %3438 }
0x2750   :  { %v2380_v46 = vpop.permute.xlu0 %2379 }
0x2751   :  { %v2382_v48 = vmul.f32 %v3435_v44, %v2380_v46 }
0x2753   :  { %2384 = vrot.lane.b32.xlu1 %v2382_v48, %s3501_s7 }
0x2762   :  { %v2575_v43 = vpop.permute.xlu0 %2574 }
0x2763   :  { %v2577_v51 = vmul.f32 %v3439_v50, %v2575_v43 }
0x2765   :  { %3440 = vtanh.f32 %v2577_v51 }
0x276f   :  { %v3441_v52 = vpop.eup %3440 }
0x2770   :  { %2580 = vrot.lane.b32.xlu0 %v3441_v52, %s3498_s3 }
0x27c5   :  { %v2385_v54 = vpop.permute.xlu1 %2384 }
0x27c6   :  { %v2387_v56 = vadd.f32 %v2385_v54, %v2377_v53 }
0x27c8   :  { %3442 = vtanh.f32 %v2387_v56 }
0x27d2   :  { %v3443_v57 = vpop.eup %3442 }
0x27d3   :  { %2390 = vrot.lane.b32.xlu1 %v3443_v57, %s3501_s7 }
0x27e2   :  { %v2581_v58 = vpop.permute.xlu0 %2580 }
0x27e3   :  { %v2583_v1 = vmul.f32 %v3439_v50, %v2581_v58 }
0x27e5   :  { %3444 = vtanh.f32 %v2583_v1 }
0x27ef   :  { %v3445_v11 = vpop.eup %3444 }
0x27f0   :  { %2591 = vrot.lane.b32.xlu0 %v3445_v11, %s3502_s29 }
0x2845   :  { %v2391_v12 = vpop.permute.xlu1 %2390 }
0x2846   :  { %v2393_v13 = vmul.f32 %v3435_v44, %v2391_v12 }
0x2848   :  { %3446 = vtanh.f32 %v2393_v13 }
0x2852   :  { %v3447_v15 = vpop.eup %3446 }
0x2853   :  { %2587 = vrot.lane.b32.xlu1 %v3447_v15, %s3498_s3 }
0x2862   :  { %v2592_v16 = vpop.permute.xlu0 %2591 }
0x28c5   :  { %v2588_v17 = vpop.permute.xlu1 %2587 }
0x28c6   :  { %v2594_v19 = vsel %vm1562_vm3, %v2588_v17, %v2592_v16 }
0x28c7   :  { %2595 = vst.msk [vmem:[#allocation8] sm:$0x3] %vm395_vm1, %v2594_v19  ;;  %3037 = vmatmul.mubr.msk.f32.vlgmr.msra.gmra.mrb[20].mxu0 %vm126_vm0, %v2594_v19 }
0x28c8   :  { %3459 = shalt.err (!%p3456_p4)
}
0x28c9   :  { %s3460_s17 = scalar_lea.hbm %s4174_s14, 32 }
0x28ca   :  { %p3461_p5 = scmp.ne.s32.totalorder %s4174_s14, %s3460_s17  ;;  %p3464_p6 = scmp.lt.u32.totalorder %s3460_s17, %s4174_s14 }
0x28cc   :  { %p3466_p7 = pnand %p3464_p6, %p3461_p5 }
0x28ce   :  { %3469 = shalt.err (!%p3466_p7)
}
0x28cf   :  { %2705 = dma.vmem_to_hbm [thread:$0]  %s2703_s30, 32, %s4174_s14, [#allocation9]   ;;  %v2767_v0 = vld [vmem:[%s4172_s12] ss:$0 sm:$0xff]  ;;  %vm2684_vm4 = vcmask 33792  }
0x28d0   :  { %s3504_s4 = smov [#allocation6]  }
0x28d1   :  { %s2692_s5 = sshll.u32 %s3504_s4, 4  ;;  %s2693_s5 = int_to_ptr.vmem [resolvable:$true] %s2692_s5 }
0x28d2   :  { %s3470_s22 = scalar_lea.vmem %s2693_s5, 32  ;;  %p3475_p9 = scmp.lt.s32.totalorder %s2693_s5, %s2693_s5 }
0x28d3   :  { %p3471_p8 = scmp.ne.s32.totalorder %s2693_s5, %s3470_s22  ;;  %p3476_p10 = scmp.lt.s32.totalorder %s3470_s22, %s3470_s22 }
0x28d5   :  { %p3477_p11 = por %p3476_p10, %p3475_p9 }
0x28d7   :  { %p3478_p12 = pnand %p3477_p11, %p3471_p8 }
0x299a   :  { %v2680_v21 = vpop.f32.mrb[20].mxu0 }
0x299b   :  { %v2681_v22 = vadd.f32 %v2767_v0, %v2680_v21  ;;  %v3038_v23 = vpop.f32.mrb[21].mxu0 }
0x299d   :  { %2685 = vst.msk [vmem:[#allocation6] sm:$0x3] %vm2684_vm4, %v2681_v22 }
0x299e   :  { %3481 = shalt.err (!%p3478_p12)
}
0x299f   :  { %s3482_s9 = scalar_lea.hbm %s4173_s13, 32 }
0x29a0   :  { %p3483_p13 = scmp.ne.s32.totalorder %s4173_s13, %s3482_s9  ;;  %p3486_p0 = scmp.lt.u32.totalorder %s3482_s9, %s4173_s13 }
0x29a2   :  { %p3488_p1 = pnand %p3486_p0, %p3483_p13 }
0x29a4   :  { %3491 = shalt.err (!%p3488_p1)
}
0x29a5   :  { %2695 = dma.vmem_to_hbm [thread:$0]  %s2693_s5, 32, %s4173_s13, [#allocation7]  }
0x29a6   :  { %3492 = dma.done.wait [#allocation7], 32  }
0x29a7   :  { %3493 = vsyncadd [#allocation7], 4294967264 }
0x29a8   :  { %3494 = dma.done.wait [#allocation9], 32  }
0x29a9   :  { %3495 = vsyncadd [#allocation9], 4294967264 }
0x29aa   :  { %2712 = vsyncpa [#allocation7], 1 }
0x29ab   :  { %2713 = vsyncpa [#allocation9], 1 }

</bundles_post_ra>
